<compile_context>
chip_gen: v6e
topology: v6e:2x2x1
jax: 0.10.0
libtpu: 0.0.40
codegen_flags: <defaults>
</compile_context>

<pallas_src>
import functools

import jax
import jax.numpy as jnp
from jax import lax
from jax.experimental import pallas as pl
from jax.experimental.pallas import tpu as pltpu


def _double_conv2_kernel(x_ref, m_ref, w1_ref, w2_ref, ws_ref, sh_ref, o_ref,
                         *, Wp, TR):
  S_in = (TR + 4) * Wp       # input rows incl. 2 halo rows per side (padded width)
  L_mid = (TR + 2) * Wp      # conv1 output rows (1 halo row per side for conv2)
  S_out = TR * Wp            # output rows of this block

  xb = x_ref[0, 0]           # (S_in, Cin), compute dtype
  b1 = sh_ref[0:1, :]
  b2 = sh_ref[1:2, :]
  bs = sh_ref[2:3, :]

  def conv3x3(inp, w_ref, rows):
    # inp: (rows + 2*Wp, C) compute dtype; w_ref: (3, 3*C, Cout) with the column
    # offset kx on the leading axis and (ky, ci) flattened on the K axis.
    # out[j] = sum_dx (x3 @ W[dx])[j + dx]   with x3[m] = [inp[m], inp[m+Wp], inp[m+2Wp]]
    x3 = jnp.concatenate(
        [inp[0:rows], inp[Wp:Wp + rows], inp[2 * Wp:2 * Wp + rows]], axis=-1)
    acc = jnp.dot(x3, w_ref[1], preferred_element_type=jnp.float32)       # dx = 0
    zl = jnp.dot(x3, w_ref[0], preferred_element_type=jnp.float32)        # dx = -1
    acc = acc + pltpu.roll(zl, shift=1, axis=0)
    zr = jnp.dot(x3, w_ref[2], preferred_element_type=jnp.float32)        # dx = +1
    acc = acc + pltpu.roll(zr, shift=rows - 1, axis=0)
    return acc                                                            # f32

  # conv1 + BN1(folded) + ReLU on the TR+2 mid rows; the precomputed mask zeroes
  # pad columns and out-of-image halo rows so conv2 sees exact zero padding.
  y1 = jnp.maximum(conv3x3(xb, w1_ref, L_mid) + b1, 0.0) * m_ref[0]       # (L_mid, Cout)

  # conv2 + BN2(folded) + ReLU on the TR interior rows.
  y2 = jnp.maximum(conv3x3(y1.astype(xb.dtype), w2_ref, S_out) + b2, 0.0)

  # skip: 1x1 conv (plain channel matmul) + BNs(folded) + ReLU, interior rows.
  xs = xb[2 * Wp: 2 * Wp + S_out]
  ys = jnp.maximum(
      jnp.dot(xs, ws_ref[...], preferred_element_type=jnp.float32) + bs, 0.0)

  o_ref[0] = (y2 + ys).astype(o_ref.dtype)


def _fold_bn(gamma, beta, mean, var, eps=1e-5):
  scale = gamma / jnp.sqrt(var + eps)
  shift = beta - mean * scale
  return scale.astype(jnp.float32), shift.astype(jnp.float32)


def _fold_conv3x3(w_oihw, scale, dtype):
  # (O, I, 3, 3) torch layout -> (kx, ky*I, O): leading axis = column offset dx,
  # K axis = (row offset dy, input channel) to match the dy lane-concat operand.
  o, i, kh, kw = w_oihw.shape
  w = jnp.transpose(w_oihw, (3, 2, 1, 0)).reshape(kw, kh * i, o)
  return (w * scale[None, None, :]).astype(dtype)


def _vmem_capacity_bytes():
  try:
    info = pltpu.get_tpu_info()
    cap = getattr(info, "vmem_capacity_bytes", None)
    if cap:
      return int(cap)
  except Exception:
    pass
  return 64 * 1024 * 1024          # conservative: v7x per-TensorCore VMEM


def _working_set_bytes(tr, Wp, cin, cout, cb, ob):
  s_in, l_mid, s_out = (tr + 4) * Wp, (tr + 2) * Wp, tr * Wp
  b = 2 * s_in * cin * cb                    # double-buffered input block
  b += l_mid * 3 * cin * cb                  # conv1 dy-concat operand
  b += 3 * l_mid * cout * 4                  # conv1 f32 partials / y1
  b += l_mid * cout * cb                     # y1 cast for conv2
  b += s_out * 3 * cout * cb                 # conv2 dy-concat operand
  b += 3 * s_out * cout * 4                  # conv2 f32 partials / y2
  b += s_out * cout * 4                      # skip branch
  b += 2 * s_out * cout * ob                 # double-buffered output block
  b += 2 * ((9 * cin + 9 * cout + cin) * cout * cb + 12 * cout + 4 * l_mid)
  return b


def _pick_row_block(H, Wp, cin, cout, cb, ob, budget):
  best = 1
  for d in range(1, H + 1):
    if H % d == 0 and _working_set_bytes(d, Wp, cin, cout, cb, ob) <= budget:
      best = d
  return best


def double_conv2_pallas(x_nchw, p, row_block=None, compute_dtype=jnp.bfloat16,
                        out_dtype=jnp.float32):
  N, Cin, H, W = x_nchw.shape
  Cout = p['w1'].shape[0]

  # Padded width: >= 1 zero column each side, rounded up to a multiple of 8 so
  # every row-offset slice in the kernel is sublane-aligned.
  Wp = ((W + 2 + 7) // 8) * 8
  pad_r = Wp - W - 1

  cb = jnp.dtype(compute_dtype).itemsize
  ob = jnp.dtype(out_dtype).itemsize
  cap = _vmem_capacity_bytes()
  vmem_limit = max(32 * 1024 * 1024, min(cap * 3 // 4, 112 * 1024 * 1024))
  budget = int(vmem_limit * 0.6)

  TR = row_block if row_block is not None else _pick_row_block(
      H, Wp, Cin, Cout, cb, ob, budget)
  assert H % TR == 0, (H, TR)
  NB = H // TR
  S_in_blk = (TR + 4) * Wp
  L_mid_blk = (TR + 2) * Wp
  S_out_blk = TR * Wp

  # Inference-mode BN folded into the weights; only the shifts reach the kernel.
  s1, b1 = _fold_bn(p['g1'], p['b1'], p['m1'], p['v1'])
  s2, b2 = _fold_bn(p['g2'], p['b2'], p['m2'], p['v2'])
  ss, bs = _fold_bn(p['gs'], p['bs'], p['ms'], p['vs'])
  w1f = _fold_conv3x3(p['w1'], s1, compute_dtype)                 # (3, 3*Cin,  Cout)
  w2f = _fold_conv3x3(p['w2'], s2, compute_dtype)                 # (3, 3*Cout, Cout)
  wsf = (jnp.transpose(p['ws'][:, :, 0, 0]) * ss[None, :]).astype(compute_dtype)
  shifts = jnp.stack([b1, b2, bs], axis=0)                        # (3, Cout) f32

  # NHWC in compute dtype, zero-pad 2 rows top/bottom and the columns, then
  # gather the overlapping halo'd row blocks.
  x_nhwc = jnp.transpose(x_nchw, (0, 2, 3, 1)).astype(compute_dtype)
  x_pad = jnp.pad(x_nhwc, ((0, 0), (2, 2), (1, pad_r), (0, 0)))
  x_blk = jnp.stack(
      [x_pad[:, r * TR: r * TR + TR + 4] for r in range(NB)], axis=1)
  x_blk = x_blk.reshape(N, NB, S_in_blk, Cin)

  # y1 validity mask (per row block): 1 where the conv1 output row is inside the
  # image AND the column is a real (non-pad) column, else 0.
  rm = jnp.arange(TR + 2)
  orig_rows = (jnp.arange(NB) * TR)[:, None] - 1 + rm[None, :]    # (NB, TR+2)
  row_ok = (orig_rows >= 0) & (orig_rows < H)
  pc = jnp.arange(Wp)
  col_ok = (pc >= 1) & (pc <= W)
  y1_mask = (row_ok[:, :, None] & col_ok[None, None, :]).astype(jnp.float32)
  y1_mask = y1_mask.reshape(NB, L_mid_blk, 1)

  kernel = functools.partial(_double_conv2_kernel, Wp=Wp, TR=TR)

  out_flat = pl.pallas_call(
      kernel,
      out_shape=jax.ShapeDtypeStruct((N, H * Wp, Cout), out_dtype),
      grid=(N, NB),
      in_specs=[
          pl.BlockSpec((1, 1, S_in_blk, Cin), lambda n, r: (n, r, 0, 0)),
          pl.BlockSpec((1, L_mid_blk, 1), lambda n, r: (r, 0, 0)),
          pl.BlockSpec(w1f.shape, lambda n, r: (0, 0, 0)),
          pl.BlockSpec(w2f.shape, lambda n, r: (0, 0, 0)),
          pl.BlockSpec(wsf.shape, lambda n, r: (0, 0)),
          pl.BlockSpec(shifts.shape, lambda n, r: (0, 0)),
      ],
      out_specs=pl.BlockSpec((1, S_out_blk, Cout), lambda n, r: (n, r, 0)),
      compiler_params=pltpu.CompilerParams(
          dimension_semantics=("parallel", "parallel"),
          vmem_limit_bytes=int(vmem_limit)),
  )(x_blk, y1_mask, w1f, w2f, wsf, shifts)

  out = out_flat.reshape(N, H, Wp, Cout)[:, :, 1:W + 1, :]
  return jnp.transpose(out, (0, 3, 1, 2))


def double_conv2_reference(x, p, eps=1e-5):
  def conv(inp, w, pad):
    return lax.conv_general_dilated(
        inp, w, (1, 1), [(pad, pad), (pad, pad)],
        dimension_numbers=('NCHW', 'OIHW', 'NCHW'))

  def bn(inp, g, b, m, v):
    g, b, m, v = (a[None, :, None, None] for a in (g, b, m, v))
    return (inp - m) / jnp.sqrt(v + eps) * g + b

  y = jax.nn.relu(bn(conv(x, p['w1'], 1), p['g1'], p['b1'], p['m1'], p['v1']))
  y = jax.nn.relu(bn(conv(y, p['w2'], 1), p['g2'], p['b2'], p['m2'], p['v2']))
  s = jax.nn.relu(bn(conv(x, p['ws'], 0), p['gs'], p['bs'], p['ms'], p['vs']))
  return y + s


def make_params(key, cin, cout):
  ks = jax.random.split(key, 15)
  f32 = jnp.float32
  return {
      'w1': 0.2 * jax.random.normal(ks[0], (cout, cin, 3, 3), f32),
      'g1': 1.0 + 0.1 * jax.random.normal(ks[1], (cout,), f32),
      'b1': 0.1 * jax.random.normal(ks[2], (cout,), f32),
      'm1': 0.1 * jax.random.normal(ks[3], (cout,), f32),
      'v1': 0.5 + jax.random.uniform(ks[4], (cout,), f32),
      'w2': 0.2 * jax.random.normal(ks[5], (cout, cout, 3, 3), f32),
      'g2': 1.0 + 0.1 * jax.random.normal(ks[6], (cout,), f32),
      'b2': 0.1 * jax.random.normal(ks[7], (cout,), f32),
      'm2': 0.1 * jax.random.normal(ks[8], (cout,), f32),
      'v2': 0.5 + jax.random.uniform(ks[9], (cout,), f32),
      'ws': 0.2 * jax.random.normal(ks[10], (cout, cin, 1, 1), f32),
      'gs': 1.0 + 0.1 * jax.random.normal(ks[11], (cout,), f32),
      'bs': 0.1 * jax.random.normal(ks[12], (cout,), f32),
      'ms': 0.1 * jax.random.normal(ks[13], (cout,), f32),
      'vs': 0.5 + jax.random.uniform(ks[14], (cout,), f32),
  }


if __name__ == "__main__":
  key = jax.random.PRNGKey(0)
  kx, kp = jax.random.split(key)

  N, Cin, Cout, H, W = 2, 4, 8, 16, 16
  x = jax.random.normal(kx, (N, Cin, H, W), jnp.float32)
  params = make_params(kp, Cin, Cout)

  ref = double_conv2_reference(x, params)

  # f32 path with 2 row blocks: tight check of the halo / dy-concat / dx-roll /
  # validity-mask / BN-folding logic.
  out_f32 = jax.block_until_ready(
      double_conv2_pallas(x, params, row_block=8, compute_dtype=jnp.float32))
  assert out_f32.shape == (N, Cout, H, W), out_f32.shape
  err_f32 = float(jnp.max(jnp.abs(out_f32 - ref)))
  assert jnp.allclose(out_f32, ref, atol=2e-4, rtol=2e-4), err_f32

  # bf16 path (default, auto row-block from VMEM budget): loose check.
  out_bf16 = jax.block_until_ready(double_conv2_pallas(x, params))
  assert out_bf16.shape == (N, Cout, H, W), out_bf16.shape
  err_bf16 = float(jnp.max(jnp.abs(out_bf16 - ref)))
  assert jnp.allclose(out_bf16, ref, atol=1e-1, rtol=1e-1), err_bf16

  print("KERNEL_OK")
</pallas_src>

<mosaic_0001>
module attributes {stable_mosaic.version = 11 : i64} {
  func.func @_double_conv2_kernel(%arg0: i32, %arg1: i32, %arg2: memref<1x1x288x4xf32, #tpu.memory_space<vmem>>, %arg3: memref<1x240x1xf32, #tpu.memory_space<vmem>>, %arg4: memref<3x12x8xf32, #tpu.memory_space<vmem>>, %arg5: memref<3x24x8xf32, #tpu.memory_space<vmem>>, %arg6: memref<4x8xf32, #tpu.memory_space<vmem>>, %arg7: memref<3x8xf32, #tpu.memory_space<vmem>>, %arg8: memref<1x192x8xf32, #tpu.memory_space<vmem>>) attributes {dimension_semantics = [#tpu.dimension_semantics<parallel>, #tpu.dimension_semantics<parallel>], iteration_bounds = array<i64: 2, 2>, scalar_prefetch = 0 : i64, scratch_operands = 0 : i64, tpu.core_type = #tpu.core_type<tc>, window_params = [{transform_indices = @transform_0, window_bounds = array<i64: 1, 1, 288, 4>}, {transform_indices = @transform_1, window_bounds = array<i64: 1, 240, 1>}, {pipeline_mode = #tpu.pipeline_mode<synchronous>, transform_indices = @transform_2, window_bounds = array<i64: 3, 12, 8>}, {pipeline_mode = #tpu.pipeline_mode<synchronous>, transform_indices = @transform_3, window_bounds = array<i64: 3, 24, 8>}, {pipeline_mode = #tpu.pipeline_mode<synchronous>, transform_indices = @transform_4, window_bounds = array<i64: 4, 8>}, {pipeline_mode = #tpu.pipeline_mode<synchronous>, transform_indices = @transform_5, window_bounds = array<i64: 3, 8>}, {transform_indices = @transform_6, window_bounds = array<i64: 1, 192, 8>}]} {
    %c0 = arith.constant 0 : index
    %c0_0 = arith.constant 0 : index
    %c0_1 = arith.constant 0 : index
    %c0_2 = arith.constant 0 : index
    %0 = vector.load %arg2[%c0, %c0_0, %c0_1, %c0_2] : memref<1x1x288x4xf32, #tpu.memory_space<vmem>>, vector<1x1x288x4xf32>
    %1 = vector.shape_cast %0 : vector<1x1x288x4xf32> to vector<288x4xf32>
    %c0_3 = arith.constant 0 : index
    %c0_4 = arith.constant 0 : index
    %2 = vector.load %arg7[%c0_3, %c0_4] : memref<3x8xf32, #tpu.memory_space<vmem>>, vector<1x8xf32>
    %c1 = arith.constant 1 : index
    %c0_5 = arith.constant 0 : index
    %3 = vector.load %arg7[%c1, %c0_5] : memref<3x8xf32, #tpu.memory_space<vmem>>, vector<1x8xf32>
    %c2 = arith.constant 2 : index
    %c0_6 = arith.constant 0 : index
    %4 = vector.load %arg7[%c2, %c0_6] : memref<3x8xf32, #tpu.memory_space<vmem>>, vector<1x8xf32>
    %5 = vector.extract_strided_slice %1 {offsets = [0, 0], sizes = [240, 4], strides = [1, 1]} : vector<288x4xf32> to vector<240x4xf32>
    %6 = vector.extract_strided_slice %1 {offsets = [24, 0], sizes = [240, 4], strides = [1, 1]} : vector<288x4xf32> to vector<240x4xf32>
    %7 = vector.extract_strided_slice %1 {offsets = [48, 0], sizes = [240, 4], strides = [1, 1]} : vector<288x4xf32> to vector<240x4xf32>
    %8 = tpu.concatenate %5, %6, %7 in 1 : vector<240x4xf32>, vector<240x4xf32>, vector<240x4xf32> -> vector<240x12xf32>
    %c1_7 = arith.constant 1 : index
    %c0_8 = arith.constant 0 : index
    %c0_9 = arith.constant 0 : index
    %9 = vector.load %arg4[%c1_7, %c0_8, %c0_9] : memref<3x12x8xf32, #tpu.memory_space<vmem>>, vector<1x12x8xf32>
    %10 = vector.shape_cast %9 : vector<1x12x8xf32> to vector<12x8xf32>
    %cst = arith.constant dense<0.000000e+00> : vector<240x8xf32>
    %11 = tpu.matmul %8, %10, %cst {dimension_numbers = #tpu.dot_dimension_numbers<[1], [0], [0], [1], [0, 0, 1, 1], [], []>} : vector<240x12xf32>, vector<12x8xf32>, vector<240x8xf32> -> vector<240x8xf32>
    %c0_10 = arith.constant 0 : index
    %c0_11 = arith.constant 0 : index
    %c0_12 = arith.constant 0 : index
    %12 = vector.load %arg4[%c0_10, %c0_11, %c0_12] : memref<3x12x8xf32, #tpu.memory_space<vmem>>, vector<1x12x8xf32>
    %13 = vector.shape_cast %12 : vector<1x12x8xf32> to vector<12x8xf32>
    %cst_13 = arith.constant dense<0.000000e+00> : vector<240x8xf32>
    %14 = tpu.matmul %8, %13, %cst_13 {dimension_numbers = #tpu.dot_dimension_numbers<[1], [0], [0], [1], [0, 0, 1, 1], [], []>} : vector<240x12xf32>, vector<12x8xf32>, vector<240x8xf32> -> vector<240x8xf32>
    %c1_i32 = arith.constant 1 : i32
    %15 = tpu.dynamic_rotate %14 by %c1_i32 dim 0 : vector<240x8xf32>, i32 -> vector<240x8xf32>
    %16 = arith.addf %11, %15 : vector<240x8xf32>
    %c2_14 = arith.constant 2 : index
    %c0_15 = arith.constant 0 : index
    %c0_16 = arith.constant 0 : index
    %17 = vector.load %arg4[%c2_14, %c0_15, %c0_16] : memref<3x12x8xf32, #tpu.memory_space<vmem>>, vector<1x12x8xf32>
    %18 = vector.shape_cast %17 : vector<1x12x8xf32> to vector<12x8xf32>
    %cst_17 = arith.constant dense<0.000000e+00> : vector<240x8xf32>
    %19 = tpu.matmul %8, %18, %cst_17 {dimension_numbers = #tpu.dot_dimension_numbers<[1], [0], [0], [1], [0, 0, 1, 1], [], []>} : vector<240x12xf32>, vector<12x8xf32>, vector<240x8xf32> -> vector<240x8xf32>
    %c239_i32 = arith.constant 239 : i32
    %20 = tpu.dynamic_rotate %19 by %c239_i32 dim 0 : vector<240x8xf32>, i32 -> vector<240x8xf32>
    %21 = arith.addf %16, %20 : vector<240x8xf32>
    %22 = vector.broadcast %2 : vector<1x8xf32> to vector<240x8xf32>
    %23 = arith.addf %21, %22 : vector<240x8xf32>
    %cst_18 = arith.constant 0.000000e+00 : f32
    %24 = vector.broadcast %cst_18 : f32 to vector<240x8xf32>
    %25 = arith.maximumf %23, %24 : vector<240x8xf32>
    %c0_19 = arith.constant 0 : index
    %c0_20 = arith.constant 0 : index
    %c0_21 = arith.constant 0 : index
    %26 = vector.load %arg3[%c0_19, %c0_20, %c0_21] : memref<1x240x1xf32, #tpu.memory_space<vmem>>, vector<1x240x1xf32>
    %27 = vector.shape_cast %26 : vector<1x240x1xf32> to vector<240x1xf32>
    %28 = vector.broadcast %27 : vector<240x1xf32> to vector<240x8xf32>
    %29 = arith.mulf %25, %28 : vector<240x8xf32>
    %30 = vector.extract_strided_slice %29 {offsets = [0, 0], sizes = [192, 8], strides = [1, 1]} : vector<240x8xf32> to vector<192x8xf32>
    %31 = vector.extract_strided_slice %29 {offsets = [24, 0], sizes = [192, 8], strides = [1, 1]} : vector<240x8xf32> to vector<192x8xf32>
    %32 = vector.extract_strided_slice %29 {offsets = [48, 0], sizes = [192, 8], strides = [1, 1]} : vector<240x8xf32> to vector<192x8xf32>
    %33 = tpu.concatenate %30, %31, %32 in 1 : vector<192x8xf32>, vector<192x8xf32>, vector<192x8xf32> -> vector<192x24xf32>
    %c1_22 = arith.constant 1 : index
    %c0_23 = arith.constant 0 : index
    %c0_24 = arith.constant 0 : index
    %34 = vector.load %arg5[%c1_22, %c0_23, %c0_24] : memref<3x24x8xf32, #tpu.memory_space<vmem>>, vector<1x24x8xf32>
    %35 = vector.shape_cast %34 : vector<1x24x8xf32> to vector<24x8xf32>
    %cst_25 = arith.constant dense<0.000000e+00> : vector<192x8xf32>
    %36 = tpu.matmul %33, %35, %cst_25 {dimension_numbers = #tpu.dot_dimension_numbers<[1], [0], [0], [1], [0, 0, 1, 1], [], []>} : vector<192x24xf32>, vector<24x8xf32>, vector<192x8xf32> -> vector<192x8xf32>
    %c0_26 = arith.constant 0 : index
    %c0_27 = arith.constant 0 : index
    %c0_28 = arith.constant 0 : index
    %37 = vector.load %arg5[%c0_26, %c0_27, %c0_28] : memref<3x24x8xf32, #tpu.memory_space<vmem>>, vector<1x24x8xf32>
    %38 = vector.shape_cast %37 : vector<1x24x8xf32> to vector<24x8xf32>
    %cst_29 = arith.constant dense<0.000000e+00> : vector<192x8xf32>
    %39 = tpu.matmul %33, %38, %cst_29 {dimension_numbers = #tpu.dot_dimension_numbers<[1], [0], [0], [1], [0, 0, 1, 1], [], []>} : vector<192x24xf32>, vector<24x8xf32>, vector<192x8xf32> -> vector<192x8xf32>
    %c1_i32_30 = arith.constant 1 : i32
    %40 = tpu.dynamic_rotate %39 by %c1_i32_30 dim 0 : vector<192x8xf32>, i32 -> vector<192x8xf32>
    %41 = arith.addf %36, %40 : vector<192x8xf32>
    %c2_31 = arith.constant 2 : index
    %c0_32 = arith.constant 0 : index
    %c0_33 = arith.constant 0 : index
    %42 = vector.load %arg5[%c2_31, %c0_32, %c0_33] : memref<3x24x8xf32, #tpu.memory_space<vmem>>, vector<1x24x8xf32>
    %43 = vector.shape_cast %42 : vector<1x24x8xf32> to vector<24x8xf32>
    %cst_34 = arith.constant dense<0.000000e+00> : vector<192x8xf32>
    %44 = tpu.matmul %33, %43, %cst_34 {dimension_numbers = #tpu.dot_dimension_numbers<[1], [0], [0], [1], [0, 0, 1, 1], [], []>} : vector<192x24xf32>, vector<24x8xf32>, vector<192x8xf32> -> vector<192x8xf32>
    %c191_i32 = arith.constant 191 : i32
    %45 = tpu.dynamic_rotate %44 by %c191_i32 dim 0 : vector<192x8xf32>, i32 -> vector<192x8xf32>
    %46 = arith.addf %41, %45 : vector<192x8xf32>
    %47 = vector.broadcast %3 : vector<1x8xf32> to vector<192x8xf32>
    %48 = arith.addf %46, %47 : vector<192x8xf32>
    %cst_35 = arith.constant 0.000000e+00 : f32
    %49 = vector.broadcast %cst_35 : f32 to vector<192x8xf32>
    %50 = arith.maximumf %48, %49 : vector<192x8xf32>
    %51 = vector.extract_strided_slice %1 {offsets = [48, 0], sizes = [192, 4], strides = [1, 1]} : vector<288x4xf32> to vector<192x4xf32>
    %c0_36 = arith.constant 0 : index
    %c0_37 = arith.constant 0 : index
    %52 = vector.load %arg6[%c0_36, %c0_37] : memref<4x8xf32, #tpu.memory_space<vmem>>, vector<4x8xf32>
    %cst_38 = arith.constant dense<0.000000e+00> : vector<192x8xf32>
    %53 = tpu.matmul %51, %52, %cst_38 {dimension_numbers = #tpu.dot_dimension_numbers<[1], [0], [0], [1], [0, 0, 1, 1], [], []>} : vector<192x4xf32>, vector<4x8xf32>, vector<192x8xf32> -> vector<192x8xf32>
    %54 = vector.broadcast %4 : vector<1x8xf32> to vector<192x8xf32>
    %55 = arith.addf %53, %54 : vector<192x8xf32>
    %cst_39 = arith.constant 0.000000e+00 : f32
    %56 = vector.broadcast %cst_39 : f32 to vector<192x8xf32>
    %57 = arith.maximumf %55, %56 : vector<192x8xf32>
    %58 = arith.addf %50, %57 : vector<192x8xf32>
    %c0_40 = arith.constant 0 : index
    %c0_41 = arith.constant 0 : index
    %c0_42 = arith.constant 0 : index
    %59 = vector.load %arg8[%c0_40, %c0_41, %c0_42] : memref<1x192x8xf32, #tpu.memory_space<vmem>>, vector<1x192x8xf32>
    %60 = vector.shape_cast %59 : vector<1x192x8xf32> to vector<192x8xf32>
    %61 = vector.shape_cast %58 : vector<192x8xf32> to vector<1x192x8xf32>
    tpu.vector_store %arg8[%c0_40, %c0_41, %c0_42], %61 {strides = array<i32>} : memref<1x192x8xf32, #tpu.memory_space<vmem>>, vector<1x192x8xf32>,
    return
  }
  func.func @transform_0(%arg0: i32, %arg1: i32) -> (i32, i32, i32, i32) {
    %c0_i32 = arith.constant 0 : i32
    %c0_i32_0 = arith.constant 0 : i32
    %c0_i32_1 = arith.constant 0 : i32
    return %arg0, %arg1, %c0_i32, %c0_i32_0 : i32, i32, i32, i32
  }
  func.func @transform_1(%arg0: i32, %arg1: i32) -> (i32, i32, i32) {
    %c0_i32 = arith.constant 0 : i32
    %c0_i32_0 = arith.constant 0 : i32
    %c0_i32_1 = arith.constant 0 : i32
    return %arg1, %c0_i32, %c0_i32_0 : i32, i32, i32
  }
  func.func @transform_2(%arg0: i32, %arg1: i32) -> (i32, i32, i32) {
    %c0_i32 = arith.constant 0 : i32
    %c0_i32_0 = arith.constant 0 : i32
    %c0_i32_1 = arith.constant 0 : i32
    %c0_i32_2 = arith.constant 0 : i32
    return %c0_i32, %c0_i32_0, %c0_i32_1 : i32, i32, i32
  }
  func.func @transform_3(%arg0: i32, %arg1: i32) -> (i32, i32, i32) {
    %c0_i32 = arith.constant 0 : i32
    %c0_i32_0 = arith.constant 0 : i32
    %c0_i32_1 = arith.constant 0 : i32
    %c0_i32_2 = arith.constant 0 : i32
    return %c0_i32, %c0_i32_0, %c0_i32_1 : i32, i32, i32
  }
  func.func @transform_4(%arg0: i32, %arg1: i32) -> (i32, i32) {
    %c0_i32 = arith.constant 0 : i32
    %c0_i32_0 = arith.constant 0 : i32
    %c0_i32_1 = arith.constant 0 : i32
    return %c0_i32, %c0_i32_0 : i32, i32
  }
  func.func @transform_5(%arg0: i32, %arg1: i32) -> (i32, i32) {
    %c0_i32 = arith.constant 0 : i32
    %c0_i32_0 = arith.constant 0 : i32
    %c0_i32_1 = arith.constant 0 : i32
    return %c0_i32, %c0_i32_0 : i32, i32
  }
  func.func @transform_6(%arg0: i32, %arg1: i32) -> (i32, i32, i32) {
    %c0_i32 = arith.constant 0 : i32
    %c0_i32_0 = arith.constant 0 : i32
    return %arg0, %arg1, %c0_i32 : i32, i32, i32
  }
}

</mosaic_0001>

<bundles_post_ra>
// kernel: tpu_custom_call.1
= control target key start
LH: loop header
LB: loop body
LE: loop exit
PB: predicated region body
PF: predicated region fallthrough
CT: control target
= control target key end

     0   :  { %s4137_s21 = smov 0   ;;  %s4139_s22 = smov 0   ;;  %s6013_s0 = inlined_call_operand.vmem [shape: f32[2,2,288,4], index: 0, kind: input, shape index: {}]   ;;  %s6014_s1 = inlined_call_operand.vmem [shape: f32[2,240,1], index: 1, kind: input, shape index: {}]   ;;  %s6015_s2 = inlined_call_operand.vmem [shape: f32[3,12,8], index: 2, kind: input, shape index: {}]   ;;  %s6016_s3 = inlined_call_operand.vmem [shape: f32[3,24,8], index: 3, kind: input, shape index: {}]   ;;  %s6017_s4 = inlined_call_operand.vmem [shape: f32[4,8], index: 4, kind: input, shape index: {}]   ;;  %s6018_s5 = inlined_call_operand.vmem [shape: f32[3,8], index: 5, kind: input, shape index: {}]   ;;  %s6019_s6 = inlined_call_operand.vmem [shape: f32[2,384,8], index: 6, kind: output, shape index: {}]  }
   0x1   :  { %s4141_s23 = smov 0   ;;  %s4143_s24 = smov 0  }
   0x2   :  { %s4145_s25 = smov 0  }
   0x3 LB: > { %s25_s26 = sadd.s32 1, %s4088_s23  ;;  %s28_s27 = sadd.s32 1, %s4092_s24  ;;  %s4096_s25 = sphi %s4145_s25, %s16_s25   ;;  %s4092_s24 = sphi %s4143_s24, %s6054_s24   ;;  %s4088_s23 = sphi %s4141_s23, %s6053_s23   ;;  %s4084_s22 = sphi %s4139_s22, %s6052_s22   ;;  %s4080_s21 = sphi %s4137_s21, %s6051_s21  }
   0x4   : > { %p26_p0 = scmp.ge.s32.totalorder %s25_s26, 2  ;;  %p3258_p1 = scmp.ge.s32.totalorder %s4096_s25, 1 }
   0x5   : > { %p242_p2 = scmp.lt.s32.totalorder %s4096_s25, 5 }
   0x6   : > { %s6056_s26 = smov (%p26_p0, %s25_s26), 0  ;;  %s6058_s27 = smov (!%p26_p0, %s28_s27), %s4092_s24 }
   0x7   : > { %p243_p3 = pnand %p3258_p1, %p242_p2  ;;  %p30_p4 = scmp.ge.s32.totalorder %s6058_s27, 2 }
   0x9   : > { %s6060_s27 = smov (%p30_p4, %s6058_s27), 0  ;;  %246 = sbr.rel (%p243_p3) target bundleno = 999 (0x3e7), region = 44 }
   0xe   : > { %p285_p5 = scmp.lt.s32.totalorder %s4084_s22, 1  ;;  %p287_p6 = scmp.lt.s32.totalorder %s4080_s21, 1  ;;  %v627_v0 = vld [vmem:[%s6015_s2 + $0x8] sm:$0xf]  ;;  %vm719_vm0 = vcmask 1043456   ;;  %v626_v1 = vld [vmem:[%s6015_s2] sm:$0xff] }
   0xf   : > { %3669 = vmatprep.subr.msk.mxu0 %vm719_vm0, %v627_v0  ;;  %s4098_s16 = smov 8   ;;  %s4099_s17 = smov 4   ;;  %v4240_v11 = vld [vmem:[%s6015_s2 + $0x18] sm:$0xf]  ;;  %v4255_v12 = vld [vmem:[%s6015_s2 + $0x10] sm:$0xff]  ;;  %vm561_vm1 = vcmask 31744  }
  0x10   : > { %s6062_s22 = smov (!%p285_p5, %s4084_s22), 1  ;;  %3670 = vmatpush3.msk.msra.mxu0 %vm719_vm0, %v627_v0  ;;  %3980 = vmatprep.subr.msk.mxu1 %vm719_vm0, %v4240_v11  ;;  %vm592_vm2 = vcmask 64512   ;;  %vm628_vm3 = vcmask 97280   ;;  %v4425_v49 = vld [vmem:[%s6015_s2 + $0x28] sm:$0xf]  ;;  %vm2000_vm6 = vcmask 130048  }
  0x11   : > { %s4181_s8 = scalar_select %p287_p6, %s4080_s21, 1  ;;  %3671 = vmatprep.subr.mxu0 %v626_v1  ;;  %3982 = vmatpush3.msk.msra.mxu1 %vm719_vm0, %v4240_v11  ;;  %vm2032_vm7 = vcmask 195584  }
  0x12   : > { %s3985_s9 = smul.u32 72, %s6062_s22  ;;  %3672 = vmatpush3.msra.mxu0 %v626_v1  ;;  %3981 = vmatprep.subr.mxu1 %v4255_v12 }
  0x13   : > { %s3984_s10 = smul.u32 36, %s4181_s8  ;;  %3718 = vmatprep.subr.msk.mxu0 %vm719_vm0, %v4240_v11  ;;  %3983 = vmatpush3.msra.mxu1 %v4255_v12 }
  0x14   : > { %s3986_s7 = smul.u32 240, %s4181_s8 }
  0x15   : > { %s291_s11 = sadd.s32 %s3985_s9, %s3984_s10 }
  0x16   : > { %s3259_s12 = sshll.u32 %s291_s11, 3  ;;  %s4487_s8 = scalar_lea.vmem %s6014_s1, %s3986_s7 }
  0x17   : > { %s4188_s15 = scalar_lea.vmem %s6013_s0, %s3259_s12  ;;  %s4101_s12 = smov 16  }
  0x18   : > { %v4191_v2 = vld [vmem:[%s4188_s15 + $0x30] sm:$0xff]  ;;  %v4194_v3 = vld [vmem:[%s4188_s15 + $0x18] sm:$0xff]  ;;  %v4204_v5 = vld [vmem:[%s4188_s15 + $0x20] sm:$0xff] }
  0x19   : > { %471 = vrot.lane.b32.xlu1 %v4191_v2, %s4098_s16  ;;  %378 = vrot.lane.b32.xlu0 %v4194_v3, %s4099_s17  ;;  %v4201_v4 = vld [vmem:[%s4188_s15 + $0x38] sm:$0xff]  ;;  %v4211_v6 = vld [vmem:[%s4188_s15 + $0x28] sm:$0xff] }
  0x1a   : > { %v4218_v7 = vld [vmem:[%s4188_s15 + $0x48] sm:$0xff]  ;;  %v4221_v8 = vld [vmem:[%s4188_s15 + $0x40] sm:$0xff]  ;;  %v4232_v9 = vld [vmem:[%s4188_s15 + $0x58] sm:$0xff] }
  0x1b   : > { %v4235_v10 = vld [vmem:[%s4188_s15 + $0x50] sm:$0xff]  ;;  %v4263_v13 = vld [vmem:[%s4188_s15 + $0x68] sm:$0xff]  ;;  %v4266_v14 = vld [vmem:[%s4188_s15 + $0x60] sm:$0xff] }
  0x1c   : > { %v4278_v15 = vld [vmem:[%s4188_s15 + $0x78] sm:$0xff]  ;;  %v4281_v16 = vld [vmem:[%s4188_s15 + $0x70] sm:$0xff]  ;;  %v4292_v17 = vld [vmem:[%s4188_s15 + $0x88] sm:$0xff] }
  0x1d   : > { %473 = vrot.lane.b32.xlu1 %v4201_v4, %s4098_s16  ;;  %380 = vrot.lane.b32.xlu0 %v4204_v5, %s4099_s17  ;;  %v4295_v18 = vld [vmem:[%s4188_s15 + $0x80] sm:$0xff]  ;;  %v4306_v19 = vld [vmem:[%s4188_s15 + $0x98] sm:$0xff] }
  0x1e   : > { %v4309_v20 = vld [vmem:[%s4188_s15 + $0x90] sm:$0xff]  ;;  %v4320_v21 = vld [vmem:[%s4188_s15 + $0xa8] sm:$0xff]  ;;  %v4323_v22 = vld [vmem:[%s4188_s15 + $0xa0] sm:$0xff] }
  0x1f   : > { %v4334_v23 = vld [vmem:[%s4188_s15 + $0xb8] sm:$0xff]  ;;  %v4337_v24 = vld [vmem:[%s4188_s15 + $0xb0] sm:$0xff]  ;;  %v4348_v25 = vld [vmem:[%s4188_s15 + $0xc8] sm:$0xff] }
  0x20   : > { %v4351_v26 = vld [vmem:[%s4188_s15 + $0xc0] sm:$0xff]  ;;  %v4362_v27 = vld [vmem:[%s4188_s15 + $0xd8] sm:$0xff]  ;;  %v4365_v28 = vld [vmem:[%s4188_s15 + $0xd0] sm:$0xff] }
  0x21   : > { %384 = vrot.lane.b32.xlu1 %v4191_v2, %s4099_s17  ;;  %382 = vrot.lane.b32.xlu0 %v4211_v6, %s4099_s17  ;;  %v4376_v29 = vld [vmem:[%s4188_s15 + $0xe8] sm:$0xff]  ;;  %v4379_v30 = vld [vmem:[%s4188_s15 + $0xe0] sm:$0xff] }
  0x22   : > { %v340_v31 = vld [vmem:[%s4188_s15 + $0xf8] sm:$0xff]  ;;  %v339_v32 = vld [vmem:[%s4188_s15 + $0xf0] sm:$0xff]  ;;  %v342_v33 = vld [vmem:[%s4188_s15 + $0x108] sm:$0xff] }
  0x23   : > { %v341_v34 = vld [vmem:[%s4188_s15 + $0x100] sm:$0xff]  ;;  %v344_v36 = vld [vmem:[%s4188_s15 + $0x118] sm:$0xff]  ;;  %v343_v37 = vld [vmem:[%s4188_s15 + $0x110] sm:$0xff] }
  0x24   : > { %v309_v35 = vld [vmem:[%s4188_s15] sm:$0xff]  ;;  %v310_v42 = vld [vmem:[%s4188_s15 + $0x8] sm:$0xff]  ;;  %v311_v50 = vld [vmem:[%s4188_s15 + $0x10] sm:$0xff] }
  0x25   : > { %477 = vrot.lane.b32.xlu1 %v4218_v7, %s4098_s16  ;;  %475 = vrot.lane.b32.xlu0 %v4221_v8, %s4098_s16 }
  0x29   : > { %388 = vrot.lane.b32.xlu1 %v4221_v8, %s4099_s17  ;;  %386 = vrot.lane.b32.xlu0 %v4201_v4, %s4099_s17 }
  0x2d   : > { %481 = vrot.lane.b32.xlu1 %v4232_v9, %s4098_s16  ;;  %479 = vrot.lane.b32.xlu0 %v4235_v10, %s4098_s16 }
  0x31   : > { %392 = vrot.lane.b32.xlu1 %v4235_v10, %s4099_s17  ;;  %390 = vrot.lane.b32.xlu0 %v4218_v7, %s4099_s17 }
  0x35   : > { %485 = vrot.lane.b32.xlu1 %v4263_v13, %s4098_s16  ;;  %483 = vrot.lane.b32.xlu0 %v4266_v14, %s4098_s16 }
  0x39   : > { %396 = vrot.lane.b32.xlu1 %v4266_v14, %s4099_s17  ;;  %394 = vrot.lane.b32.xlu0 %v4232_v9, %s4099_s17 }
  0x3d   : > { %489 = vrot.lane.b32.xlu1 %v4278_v15, %s4098_s16  ;;  %487 = vrot.lane.b32.xlu0 %v4281_v16, %s4098_s16 }
  0x41   : > { %400 = vrot.lane.b32.xlu1 %v4281_v16, %s4099_s17  ;;  %398 = vrot.lane.b32.xlu0 %v4263_v13, %s4099_s17 }
  0x45   : > { %493 = vrot.lane.b32.xlu1 %v4292_v17, %s4098_s16  ;;  %491 = vrot.lane.b32.xlu0 %v4295_v18, %s4098_s16 }
  0x49   : > { %404 = vrot.lane.b32.xlu1 %v4295_v18, %s4099_s17  ;;  %402 = vrot.lane.b32.xlu0 %v4278_v15, %s4099_s17 }
  0x4d   : > { %497 = vrot.lane.b32.xlu1 %v4306_v19, %s4098_s16  ;;  %495 = vrot.lane.b32.xlu0 %v4309_v20, %s4098_s16 }
  0x51   : > { %408 = vrot.lane.b32.xlu1 %v4309_v20, %s4099_s17  ;;  %406 = vrot.lane.b32.xlu0 %v4292_v17, %s4099_s17 }
  0x55   : > { %501 = vrot.lane.b32.xlu1 %v4320_v21, %s4098_s16  ;;  %499 = vrot.lane.b32.xlu0 %v4323_v22, %s4098_s16 }
  0x59   : > { %412 = vrot.lane.b32.xlu1 %v4323_v22, %s4099_s17  ;;  %410 = vrot.lane.b32.xlu0 %v4306_v19, %s4099_s17 }
  0x5d   : > { %505 = vrot.lane.b32.xlu1 %v4334_v23, %s4098_s16  ;;  %503 = vrot.lane.b32.xlu0 %v4337_v24, %s4098_s16 }
  0x61   : > { %416 = vrot.lane.b32.xlu1 %v4337_v24, %s4099_s17  ;;  %414 = vrot.lane.b32.xlu0 %v4320_v21, %s4099_s17 }
  0x65   : > { %509 = vrot.lane.b32.xlu1 %v4348_v25, %s4098_s16  ;;  %507 = vrot.lane.b32.xlu0 %v4351_v26, %s4098_s16 }
  0x69   : > { %420 = vrot.lane.b32.xlu1 %v4351_v26, %s4099_s17  ;;  %418 = vrot.lane.b32.xlu0 %v4334_v23, %s4099_s17 }
  0x6d   : > { %513 = vrot.lane.b32.xlu1 %v4362_v27, %s4098_s16  ;;  %511 = vrot.lane.b32.xlu0 %v4365_v28, %s4098_s16 }
  0x71   : > { %424 = vrot.lane.b32.xlu1 %v4365_v28, %s4099_s17  ;;  %422 = vrot.lane.b32.xlu0 %v4348_v25, %s4099_s17 }
  0x75   : > { %517 = vrot.lane.b32.xlu1 %v4376_v29, %s4098_s16  ;;  %515 = vrot.lane.b32.xlu0 %v4379_v30, %s4098_s16 }
  0x79   : > { %428 = vrot.lane.b32.xlu1 %v4379_v30, %s4099_s17  ;;  %426 = vrot.lane.b32.xlu0 %v4362_v27, %s4099_s17 }
  0x7d   : > { %521 = vrot.lane.b32.xlu1 %v340_v31, %s4098_s16  ;;  %519 = vrot.lane.b32.xlu0 %v339_v32, %s4098_s16 }
  0x81   : > { %432 = vrot.lane.b32.xlu1 %v339_v32, %s4099_s17  ;;  %430 = vrot.lane.b32.xlu0 %v4376_v29, %s4099_s17 }
  0x85   : > { %525 = vrot.lane.b32.xlu1 %v342_v33, %s4098_s16  ;;  %523 = vrot.lane.b32.xlu0 %v341_v34, %s4098_s16 }
  0x89   : > { %436 = vrot.lane.b32.xlu1 %v341_v34, %s4099_s17  ;;  %434 = vrot.lane.b32.xlu0 %v340_v31, %s4099_s17 }
  0x8b   : > { %v472_v38 = vpop.permute.xlu1 %471  ;;  %v379_v39 = vpop.permute.xlu0 %378 }
  0x8c   : > { %v562_v40 = vsel %vm561_vm1, %v309_v35, %v379_v39  ;;  %v4100_v39 = vmov 0  }
  0x8d   : > { %529 = vrot.lane.b32.xlu1 %v344_v36, %s4098_s16  ;;  %527 = vrot.lane.b32.xlu0 %v343_v37, %s4098_s16  ;;  %v4409_v41 = vsel %vm592_vm2, %v562_v40, %v472_v38 }
  0x8e   : > { %3673 = vmatprep.mubr.msk.f32.mxu0 %vm628_vm3, %v4409_v41  ;;  %4033 = vset.pattern.permute.xlu1 %v4100_v39 }
  0x8f   : > { %v474_v43 = vpop.permute.xlu1 %473  ;;  %v381_v44 = vpop.permute.xlu0 %380  ;;  %4032 = vset.pattern.permute.xlu0 %v4100_v39  ;;  %v1610_v39 = vld [vmem:[%s4487_s8 + $0x78] sm:$0xff] }
  0x90   : > { %v563_v45 = vsel %vm561_vm1, %v310_v42, %v381_v44  ;;  %v1602_v44 = vld [vmem:[%s4487_s8 + $0x38] sm:$0xff] }
  0x91   : > { %v4416_v46 = vsel %vm592_vm2, %v563_v45, %v474_v43  ;;  %v1601_v43 = vld [vmem:[%s4487_s8 + $0x30] sm:$0xff] }
  0x92   : > { %3674 = vmatmul.mubr.msk.f32.vlgmr.msra.gmra.mxu0 %vm628_vm3, %v4416_v46 }
  0x93   : > { %v385_v47 = vpop.permute.xlu1 %384  ;;  %v383_v48 = vpop.permute.xlu0 %382  ;;  %3719 = vmatpush3.msk.msra.mxu0 %vm719_vm0, %v4240_v11 }
  0x94   : > { %3720 = vmatprep.subr.mxu0 %v4255_v12  ;;  %v565_v51 = vsel %vm561_vm1, %v4194_v3, %v385_v47  ;;  %v564_v52 = vsel %vm561_vm1, %v311_v50, %v383_v48 }
  0x95   : > { %3721 = vmatpush3.msra.mxu0 %v4255_v12 }
  0x96   : > { %3767 = vmatprep.subr.msk.mxu0 %vm719_vm0, %v4425_v49 }
  0x97   : > { %v478_v53 = vpop.permute.xlu1 %477  ;;  %v476_v54 = vpop.permute.xlu0 %475 }
  0x98   : > { %v4436_v55 = vsel %vm592_vm2, %v565_v51, %v478_v53  ;;  %v4439_v56 = vsel %vm592_vm2, %v564_v52, %v476_v54  ;;  %v1600_v53 = vld [vmem:[%s4487_s8 + $0x28] sm:$0xff]  ;;  %v1603_v54 = vld [vmem:[%s4487_s8 + $0x40] sm:$0xff] }
  0x99   : > { %3676 = vmatprep.mubr.msk.f32.mxu0 %vm628_vm3, %v4439_v56 }
  0x9a   : > { %3677 = vmatmul.mubr.msk.f32.gmra.mxu0 %vm628_vm3, %v4436_v55 }
  0x9b   : > { %v389_v57 = vpop.permute.xlu1 %388  ;;  %v387_v58 = vpop.permute.xlu0 %386 }
  0x9c   : > { %v567_v59 = vsel %vm561_vm1, %v4211_v6, %v389_v57  ;;  %v566_v60 = vsel %vm561_vm1, %v4204_v5, %v387_v58  ;;  %v1604_v57 = vld [vmem:[%s4487_s8 + $0x48] sm:$0xff]  ;;  %v1605_v58 = vld [vmem:[%s4487_s8 + $0x50] sm:$0xff] }
  0x9f   : > { %v482_v61 = vpop.permute.xlu1 %481  ;;  %v480_v62 = vpop.permute.xlu0 %479 }
  0xa0   : > { %v4450_v63 = vsel %vm592_vm2, %v567_v59, %v482_v61  ;;  %v4453_v0 = vsel %vm592_vm2, %v566_v60, %v480_v62 }
  0xa1   : > { %3679 = vmatprep.mubr.msk.f32.mxu0 %vm628_vm3, %v4453_v0 }
  0xa2   : > { %3680 = vmatmul.mubr.msk.f32.gmra.mxu0 %vm628_vm3, %v4450_v63 }
  0xa3   : > { %v393_v1 = vpop.permute.xlu1 %392  ;;  %v391_v3 = vpop.permute.xlu0 %390 }
  0xa4   : > { %v569_v5 = vsel %vm561_vm1, %v4201_v4, %v393_v1  ;;  %v568_v6 = vsel %vm561_vm1, %v4191_v2, %v391_v3 }
  0xa7   : > { %v486_v11 = vpop.permute.xlu1 %485  ;;  %v484_v12 = vpop.permute.xlu0 %483 }
  0xa8   : > { %v4464_v31 = vsel %vm592_vm2, %v569_v5, %v486_v11  ;;  %v4467_v32 = vsel %vm592_vm2, %v568_v6, %v484_v12  ;;  %v1606_v5 = vld [vmem:[%s4487_s8 + $0x58] sm:$0xff]  ;;  %v1607_v6 = vld [vmem:[%s4487_s8 + $0x60] sm:$0xff]  ;;  %v1608_v11 = vld [vmem:[%s4487_s8 + $0x68] sm:$0xff] }
  0xa9   : > { %3682 = vmatprep.mubr.msk.f32.mxu0 %vm628_vm3, %v4467_v32  ;;  %v1609_v12 = vld [vmem:[%s4487_s8 + $0x70] sm:$0xff] }
  0xaa   : > { %3683 = vmatmul.mubr.msk.f32.gmra.mxu0 %vm628_vm3, %v4464_v31 }
  0xab   : > { %v397_v33 = vpop.permute.xlu1 %396  ;;  %v395_v34 = vpop.permute.xlu0 %394 }
  0xac   : > { %v571_v2 = vsel %vm561_vm1, %v4218_v7, %v397_v33  ;;  %v570_v4 = vsel %vm561_vm1, %v4221_v8, %v395_v34  ;;  %v1599_v7 = vld [vmem:[%s4487_s8 + $0x20] sm:$0xff]  ;;  %v1598_v8 = vld [vmem:[%s4487_s8 + $0x18] sm:$0xff] }
  0xad   : > { %1647 = vperm.xlu1 %4033, %v1599_v7   ;;  %1642 = vperm.xlu0 %4032, %v1598_v8   ;;  %v1611_v7 = vld [vmem:[%s4487_s8 + $0x80] sm:$0xff]  ;;  %v1612_v8 = vld [vmem:[%s4487_s8 + $0x88] sm:$0xff] }
  0xaf   : > { %v490_v35 = vpop.permute.xlu1 %489  ;;  %v488_v36 = vpop.permute.xlu0 %487 }
  0xb0   : > { %v4479_v37 = vsel %vm592_vm2, %v571_v2, %v490_v35  ;;  %v4482_v38 = vsel %vm592_vm2, %v570_v4, %v488_v36 }
  0xb1   : > { %3685 = vmatprep.mubr.msk.f32.mxu0 %vm628_vm3, %v4482_v38  ;;  %3734 = vmatprep.mubr.msk.f32.mxu1 %vm628_vm3, %v4482_v38 }
  0xb2   : > { %3686 = vmatmul.mubr.msk.f32.gmra.mxu0 %vm628_vm3, %v4479_v37  ;;  %3735 = vmatmul.mubr.msk.f32.vlgmr.msra.gmra.mxu1 %vm628_vm3, %v4479_v37 }
  0xb3   : > { %v401_v40 = vpop.permute.xlu1 %400  ;;  %v399_v42 = vpop.permute.xlu0 %398  ;;  %1657 = vperm.xlu1 %4033, %v1601_v43   ;;  %1662 = vperm.xlu0 %4032, %v1602_v44  }
  0xb4   : > { %v573_v45 = vsel %vm561_vm1, %v4232_v9, %v401_v40  ;;  %v572_v47 = vsel %vm561_vm1, %v4235_v10, %v399_v42  ;;  %v1613_v40 = vld [vmem:[%s4487_s8 + $0x90] sm:$0xff] }
  0xb7   : > { %v494_v48 = vpop.permute.xlu1 %493  ;;  %v492_v50 = vpop.permute.xlu0 %491  ;;  %1652 = vperm.xlu1 %4033, %v1600_v53   ;;  %1667 = vperm.xlu0 %4032, %v1603_v54   ;;  %v1615_v53 = vld [vmem:[%s4487_s8 + $0xa0] sm:$0xff]  ;;  %v1616_v54 = vld [vmem:[%s4487_s8 + $0xa8] sm:$0xff] }
  0xb8   : > { %v4506_v51 = vsel %vm592_vm2, %v573_v45, %v494_v48  ;;  %v4509_v52 = vsel %vm592_vm2, %v572_v47, %v492_v50  ;;  %v1614_v50 = vld [vmem:[%s4487_s8 + $0x98] sm:$0xff] }
  0xb9   : > { %3688 = vmatprep.mubr.msk.f32.mxu0 %vm628_vm3, %v4509_v52  ;;  %3737 = vmatprep.mubr.msk.f32.mxu1 %vm628_vm3, %v4509_v52 }
  0xba   : > { %3689 = vmatmul.mubr.msk.f32.gmra.mxu0 %vm628_vm3, %v4506_v51  ;;  %3738 = vmatmul.mubr.msk.f32.gmra.mxu1 %vm628_vm3, %v4506_v51 }
  0xbb   : > { %v405_v9 = vpop.permute.xlu1 %404  ;;  %v403_v10 = vpop.permute.xlu0 %402  ;;  %1672 = vperm.xlu1 %4033, %v1604_v57   ;;  %1677 = vperm.xlu0 %4032, %v1605_v58  }
  0xbc   : > { %v575_v59 = vsel %vm561_vm1, %v4263_v13, %v405_v9  ;;  %v574_v60 = vsel %vm561_vm1, %v4266_v14, %v403_v10  ;;  %v1617_v9 = vld [vmem:[%s4487_s8 + $0xb0] sm:$0xff] }
  0xbf   : > { %v498_v61 = vpop.permute.xlu1 %497  ;;  %v496_v62 = vpop.permute.xlu0 %495  ;;  %1682 = vperm.xlu1 %4033, %v1606_v5   ;;  %1687 = vperm.xlu0 %4032, %v1607_v6   ;;  %v1619_v5 = vld [vmem:[%s4487_s8 + $0xc0] sm:$0xff]  ;;  %v1620_v6 = vld [vmem:[%s4487_s8 + $0xc8] sm:$0xff] }
  0xc0   : > { %v4528_v1 = vsel %vm592_vm2, %v575_v59, %v498_v61  ;;  %v4531_v3 = vsel %vm592_vm2, %v574_v60, %v496_v62  ;;  %v1618_v62 = vld [vmem:[%s4487_s8 + $0xb8] sm:$0xff] }
  0xc1   : > { %3691 = vmatprep.mubr.msk.f32.mxu0 %vm628_vm3, %v4531_v3  ;;  %3740 = vmatprep.mubr.msk.f32.mxu1 %vm628_vm3, %v4531_v3 }
  0xc2   : > { %3692 = vmatmul.mubr.msk.f32.gmra.mxu0 %vm628_vm3, %v4528_v1  ;;  %3741 = vmatmul.mubr.msk.f32.gmra.mxu1 %vm628_vm3, %v4528_v1 }
  0xc3   : > { %v409_v13 = vpop.permute.xlu1 %408  ;;  %v407_v14 = vpop.permute.xlu0 %406  ;;  %1692 = vperm.xlu1 %4033, %v1608_v11   ;;  %1697 = vperm.xlu0 %4032, %v1609_v12  }
  0xc4   : > { %v577_v33 = vsel %vm561_vm1, %v4278_v15, %v409_v13  ;;  %v576_v34 = vsel %vm561_vm1, %v4281_v16, %v407_v14  ;;  %v1621_v13 = vld [vmem:[%s4487_s8 + $0xd0] sm:$0xff] }
  0xc7   : > { %v502_v2 = vpop.permute.xlu1 %501  ;;  %v500_v4 = vpop.permute.xlu0 %499  ;;  %1702 = vperm.xlu1 %4033, %v1610_v39   ;;  %1707 = vperm.xlu0 %4032, %v1611_v7   ;;  %v1623_v39 = vld [vmem:[%s4487_s8 + $0xe0] sm:$0xff]  ;;  %v1624_v7 = vld [vmem:[%s4487_s8 + $0xe8] sm:$0xff] }
  0xc8   : > { %v4550_v35 = vsel %vm592_vm2, %v577_v33, %v502_v2  ;;  %v4553_v36 = vsel %vm592_vm2, %v576_v34, %v500_v4  ;;  %v1622_v4 = vld [vmem:[%s4487_s8 + $0xd8] sm:$0xff] }
  0xc9   : > { %3694 = vmatprep.mubr.msk.f32.mxu0 %vm628_vm3, %v4553_v36  ;;  %3743 = vmatprep.mubr.msk.f32.mxu1 %vm628_vm3, %v4553_v36 }
  0xca   : > { %3695 = vmatmul.mubr.msk.f32.gmra.mxu0 %vm628_vm3, %v4550_v35  ;;  %3744 = vmatmul.mubr.msk.f32.gmra.mxu1 %vm628_vm3, %v4550_v35 }
  0xcb   : > { %v413_v15 = vpop.permute.xlu1 %412  ;;  %v411_v16 = vpop.permute.xlu0 %410  ;;  %1712 = vperm.xlu1 %4033, %v1612_v8   ;;  %1717 = vperm.xlu0 %4032, %v1613_v40  }
  0xcc   : > { %v579_v42 = vsel %vm561_vm1, %v4292_v17, %v413_v15  ;;  %v578_v43 = vsel %vm561_vm1, %v4295_v18, %v411_v16  ;;  %v1595_v15 = vld [vmem:[%s4487_s8] sm:$0xff] }
  0xcf   : > { %v506_v44 = vpop.permute.xlu1 %505  ;;  %v504_v45 = vpop.permute.xlu0 %503  ;;  %1722 = vperm.xlu1 %4033, %v1614_v50   ;;  %1727 = vperm.xlu0 %4032, %v1615_v53   ;;  %v1597_v50 = vld [vmem:[%s4487_s8 + $0x10] sm:$0xff] }
  0xd0   : > { %v4572_v47 = vsel %vm592_vm2, %v579_v42, %v506_v44  ;;  %v4575_v48 = vsel %vm592_vm2, %v578_v43, %v504_v45  ;;  %v1596_v45 = vld [vmem:[%s4487_s8 + $0x8] sm:$0xff] }
  0xd1   : > { %3697 = vmatprep.mubr.msk.f32.mxu0 %vm628_vm3, %v4575_v48  ;;  %3746 = vmatprep.mubr.msk.f32.mxu1 %vm628_vm3, %v4575_v48 }
  0xd2   : > { %3698 = vmatmul.mubr.msk.f32.gmra.mxu0 %vm628_vm3, %v4572_v47  ;;  %3747 = vmatmul.mubr.msk.f32.gmra.mxu1 %vm628_vm3, %v4572_v47 }
  0xd3   : > { %v417_v17 = vpop.permute.xlu1 %416  ;;  %v415_v18 = vpop.permute.xlu0 %414  ;;  %1732 = vperm.xlu1 %4033, %v1616_v54   ;;  %1737 = vperm.xlu0 %4032, %v1617_v9  }
  0xd4   : > { %v581_v10 = vsel %vm561_vm1, %v4306_v19, %v417_v17  ;;  %v580_v57 = vsel %vm561_vm1, %v4309_v20, %v415_v18 }
  0xd7   : > { %v510_v58 = vpop.permute.xlu1 %509  ;;  %v508_v59 = vpop.permute.xlu0 %507  ;;  %1742 = vperm.xlu1 %4033, %v1618_v62   ;;  %1747 = vperm.xlu0 %4032, %v1619_v5  }
  0xd8   : > { %v4594_v60 = vsel %vm592_vm2, %v581_v10, %v510_v58  ;;  %v4597_v61 = vsel %vm592_vm2, %v580_v57, %v508_v59 }
  0xd9   : > { %3700 = vmatprep.mubr.msk.f32.mxu0 %vm628_vm3, %v4597_v61  ;;  %3749 = vmatprep.mubr.msk.f32.mxu1 %vm628_vm3, %v4597_v61 }
  0xda   : > { %3701 = vmatmul.mubr.msk.f32.gmra.mxu0 %vm628_vm3, %v4594_v60  ;;  %3750 = vmatmul.mubr.msk.f32.gmra.mxu1 %vm628_vm3, %v4594_v60 }
  0xdb   : > { %v421_v19 = vpop.permute.xlu1 %420  ;;  %v419_v20 = vpop.permute.xlu0 %418  ;;  %1752 = vperm.xlu1 %4033, %v1620_v6   ;;  %1757 = vperm.xlu0 %4032, %v1621_v13  }
  0xdc   : > { %v583_v14 = vsel %vm561_vm1, %v4320_v21, %v421_v19  ;;  %v582_v11 = vsel %vm561_vm1, %v4323_v22, %v419_v20 }
  0xdf   : > { %v514_v12 = vpop.permute.xlu1 %513  ;;  %v512_v33 = vpop.permute.xlu0 %511  ;;  %1762 = vperm.xlu1 %4033, %v1622_v4   ;;  %1767 = vperm.xlu0 %4032, %v1623_v39  }
  0xe0   : > { %v4616_v34 = vsel %vm592_vm2, %v583_v14, %v514_v12  ;;  %v4619_v2 = vsel %vm592_vm2, %v582_v11, %v512_v33 }
  0xe1   : > { %3703 = vmatprep.mubr.msk.f32.mxu0 %vm628_vm3, %v4619_v2  ;;  %3752 = vmatprep.mubr.msk.f32.mxu1 %vm628_vm3, %v4619_v2 }
  0xe2   : > { %3704 = vmatmul.mubr.msk.f32.gmra.mxu0 %vm628_vm3, %v4616_v34  ;;  %3753 = vmatmul.mubr.msk.f32.gmra.mxu1 %vm628_vm3, %v4616_v34 }
  0xe3   : > { %v425_v21 = vpop.permute.xlu1 %424  ;;  %v423_v22 = vpop.permute.xlu0 %422  ;;  %1772 = vperm.xlu1 %4033, %v1624_v7   ;;  %1627 = vperm.xlu0 %4032, %v1595_v15  }
  0xe4   : > { %v585_v16 = vsel %vm561_vm1, %v4334_v23, %v425_v21  ;;  %v584_v8 = vsel %vm561_vm1, %v4337_v24, %v423_v22 }
  0xe7   : > { %v518_v40 = vpop.permute.xlu1 %517  ;;  %v516_v42 = vpop.permute.xlu0 %515  ;;  %1632 = vperm.xlu1 %4033, %v1596_v45   ;;  %1637 = vperm.xlu0 %4032, %v1597_v50  }
  0xe8   : > { %v4638_v43 = vsel %vm592_vm2, %v585_v16, %v518_v40  ;;  %v4641_v44 = vsel %vm592_vm2, %v584_v8, %v516_v42 }
  0xe9   : > { %3706 = vmatprep.mubr.msk.f32.mxu0 %vm628_vm3, %v4641_v44  ;;  %3755 = vmatprep.mubr.msk.f32.mxu1 %vm628_vm3, %v4641_v44 }
  0xea   : > { %3707 = vmatmul.mubr.msk.f32.gmra.mxu0 %vm628_vm3, %v4638_v43  ;;  %3756 = vmatmul.mubr.msk.f32.gmra.mxu1 %vm628_vm3, %v4638_v43 }
  0xeb   : > { %v429_v23 = vpop.permute.xlu1 %428  ;;  %v427_v24 = vpop.permute.xlu0 %426 }
  0xec   : > { %v587_v53 = vsel %vm561_vm1, %v4348_v25, %v429_v23  ;;  %v586_v17 = vsel %vm561_vm1, %v4351_v26, %v427_v24 }
  0xef   : > { %v522_v18 = vpop.permute.xlu1 %521  ;;  %v520_v54 = vpop.permute.xlu0 %519 }
  0xf0   : > { %v4658_v9 = vsel %vm592_vm2, %v587_v53, %v522_v18  ;;  %v4661_v10 = vsel %vm592_vm2, %v586_v17, %v520_v54 }
  0xf1   : > { %3709 = vmatprep.mubr.msk.f32.mxu0 %vm628_vm3, %v4661_v10  ;;  %3758 = vmatprep.mubr.msk.f32.mxu1 %vm628_vm3, %v4661_v10 }
  0xf2   : > { %3710 = vmatmul.mubr.msk.f32.gmra.mxu0 %vm628_vm3, %v4658_v9  ;;  %3759 = vmatmul.mubr.msk.f32.gmra.mxu1 %vm628_vm3, %v4658_v9 }
  0xf3   : > { %v433_v25 = vpop.permute.xlu1 %432  ;;  %v431_v26 = vpop.permute.xlu0 %430 }
  0xf4   : > { %v589_v57 = vsel %vm561_vm1, %v4362_v27, %v433_v25  ;;  %v588_v58 = vsel %vm561_vm1, %v4365_v28, %v431_v26 }
  0xf7   : > { %v526_v59 = vpop.permute.xlu1 %525  ;;  %v524_v62 = vpop.permute.xlu0 %523 }
  0xf8   : > { %v620_v5 = vsel %vm592_vm2, %v589_v57, %v526_v59  ;;  %v619_v19 = vsel %vm592_vm2, %v588_v58, %v524_v62 }
  0xf9   : > { %3712 = vmatprep.mubr.msk.f32.mxu0 %vm628_vm3, %v619_v19  ;;  %3761 = vmatprep.mubr.msk.f32.mxu1 %vm628_vm3, %v619_v19 }
  0xfa   : > { %3713 = vmatmul.mubr.msk.f32.gmra.mxu0 %vm628_vm3, %v620_v5  ;;  %3762 = vmatmul.mubr.msk.f32.gmra.mxu1 %vm628_vm3, %v620_v5 }
  0xfb   : > { %v437_v20 = vpop.permute.xlu1 %436  ;;  %v435_v6 = vpop.permute.xlu0 %434 }
  0xfc   : > { %v591_v27 = vsel %vm561_vm1, %v4376_v29, %v437_v20  ;;  %v590_v28 = vsel %vm561_vm1, %v4379_v30, %v435_v6  ;;  %v3326_v29 = vld [vmem:[%s6015_s2 + $0x20] sm:$0xff]  ;;  %v968_v30 = vlaneseq }
  0xff   : > { %v530_v13 = vpop.permute.xlu1 %529  ;;  %v528_v14 = vpop.permute.xlu0 %527 }
 0x100   : > { %v622_v11 = vsel %vm592_vm2, %v591_v27, %v530_v13  ;;  %v621_v12 = vsel %vm592_vm2, %v590_v28, %v528_v14 }
 0x101   : > { %3715 = vmatprep.mubr.msk.f32.mxu0 %vm628_vm3, %v621_v12  ;;  %3764 = vmatprep.mubr.msk.f32.mxu1 %vm628_vm3, %v621_v12 }
 0x102   : > { %3716 = vmatmul.mubr.msk.f32.gmra.mxu0 %vm628_vm3, %v622_v11  ;;  %3765 = vmatmul.mubr.msk.f32.gmra.mxu1 %vm628_vm3, %v622_v11 }
 0x103   : > { %3722 = vmatprep.mubr.msk.f32.mxu0 %vm628_vm3, %v4409_v41 }
 0x106   : > { %3723 = vmatmul.mubr.msk.f32.vlgmr.msra.gmra.mxu0 %vm628_vm3, %v4416_v46 }
 0x107   : > { %3768 = vmatpush3.msk.msra.mxu0 %vm719_vm0, %v4425_v49  ;;  %3725 = vmatprep.mubr.msk.f32.mxu0 %vm628_vm3, %v4439_v56 }
 0x108   : > { %3769 = vmatprep.subr.mxu0 %v3326_v29 }
 0x109   : > { %3770 = vmatpush3.msra.mxu0 %v3326_v29 }
 0x10a   : > { %3726 = vmatmul.mubr.msk.f32.gmra.mxu0 %vm628_vm3, %v4436_v55 }
 0x10b   : > { %3728 = vmatprep.mubr.msk.f32.mxu0 %vm628_vm3, %v4453_v0 }
 0x10e   : > { %3729 = vmatmul.mubr.msk.f32.gmra.mxu0 %vm628_vm3, %v4450_v63 }
 0x10f   : > { %3731 = vmatprep.mubr.msk.f32.mxu0 %vm628_vm3, %v4467_v32 }
 0x112   : > { %3732 = vmatmul.mubr.msk.f32.gmra.mxu0 %vm628_vm3, %v4464_v31 }
 0x113   : > { %3771 = vmatprep.mubr.msk.f32.mxu0 %vm628_vm3, %v4409_v41  ;;  %v4768_v41 = vshrl.u32 %v968_v30, 7 }
 0x115   : > { %vm970_vm4 = vcmp.lt.s32.totalorder %v4768_v41, 1  ;;  %vm1470_vm5 = vcmp.lt.s32.totalorder %v4768_v41, 7 }
 0x116   : > { %3772 = vmatmul.mubr.msk.f32.vlgmr.msra.gmra.mxu0 %vm628_vm3, %v4416_v46 }
 0x117   : > { %3774 = vmatprep.mubr.msk.f32.mxu0 %vm628_vm3, %v4439_v56 }
 0x11a   : > { %3775 = vmatmul.mubr.msk.f32.gmra.mxu0 %vm628_vm3, %v4436_v55 }
 0x11b   : > { %3777 = vmatprep.mubr.msk.f32.mxu0 %vm628_vm3, %v4453_v0 }
 0x11e   : > { %3778 = vmatmul.mubr.msk.f32.gmra.mxu0 %vm628_vm3, %v4450_v63 }
 0x11f   : > { %3780 = vmatprep.mubr.msk.f32.mxu0 %vm628_vm3, %v4467_v32 }
 0x122   : > { %3781 = vmatmul.mubr.msk.f32.gmra.mxu0 %vm628_vm3, %v4464_v31 }
 0x123   : > { %3783 = vmatprep.mubr.msk.f32.mxu0 %vm628_vm3, %v4482_v38 }
 0x126   : > { %3784 = vmatmul.mubr.msk.f32.gmra.mxu0 %vm628_vm3, %v4479_v37 }
 0x127   : > { %3786 = vmatprep.mubr.msk.f32.mxu0 %vm628_vm3, %v4509_v52 }
 0x12a   : > { %3787 = vmatmul.mubr.msk.f32.gmra.mxu0 %vm628_vm3, %v4506_v51 }
 0x12b   : > { %3789 = vmatprep.mubr.msk.f32.mxu0 %vm628_vm3, %v4531_v3 }
 0x12e   : > { %3790 = vmatmul.mubr.msk.f32.gmra.mxu0 %vm628_vm3, %v4528_v1 }
 0x12f   : > { %3792 = vmatprep.mubr.msk.f32.mxu0 %vm628_vm3, %v4553_v36 }
 0x132   : > { %3793 = vmatmul.mubr.msk.f32.gmra.mxu0 %vm628_vm3, %v4550_v35 }
 0x133   : > { %3795 = vmatprep.mubr.msk.f32.mxu0 %vm628_vm3, %v4575_v48 }
 0x136   : > { %3796 = vmatmul.mubr.msk.f32.gmra.mxu0 %vm628_vm3, %v4572_v47 }
 0x137   : > { %3798 = vmatprep.mubr.msk.f32.mxu0 %vm628_vm3, %v4597_v61 }
 0x13a   : > { %3799 = vmatmul.mubr.msk.f32.gmra.mxu0 %vm628_vm3, %v4594_v60 }
 0x13b   : > { %3801 = vmatprep.mubr.msk.f32.mxu0 %vm628_vm3, %v4619_v2 }
 0x13e   : > { %3802 = vmatmul.mubr.msk.f32.gmra.mxu0 %vm628_vm3, %v4616_v34 }
 0x13f   : > { %3804 = vmatprep.mubr.msk.f32.mxu0 %vm628_vm3, %v4641_v44 }
 0x142   : > { %3805 = vmatmul.mubr.msk.f32.gmra.mxu0 %vm628_vm3, %v4638_v43 }
 0x143   : > { %3807 = vmatprep.mubr.msk.f32.mxu0 %vm628_vm3, %v4661_v10 }
 0x146   : > { %3808 = vmatmul.mubr.msk.f32.gmra.mxu0 %vm628_vm3, %v4658_v9 }
 0x147   : > { %3810 = vmatprep.mubr.msk.f32.mxu0 %vm628_vm3, %v619_v19 }
 0x14a   : > { %3811 = vmatmul.mubr.msk.f32.gmra.mxu0 %vm628_vm3, %v620_v5 }
 0x14b   : > { %3813 = vmatprep.mubr.msk.f32.mxu0 %vm628_vm3, %v621_v12 }
 0x14e   : > { %3814 = vmatmul.mubr.msk.f32.gmra.mxu0 %vm628_vm3, %v622_v11 }
 0x152   : > { %v3675_v46 = vpop.f32.mrf.mxu0 }
 0x153   : > { %v939_v55 = vrot.slane %v3675_v46, 7 }
 0x154   : > { %v4770_v49 = vpop.f32.mrf.mxu0 }
 0x155   : > { %v938_v56 = vrot.slane %v4770_v49, 7 }
 0x157   : > { %v4778_v63 = vsel %vm970_vm4, %v938_v56, %v939_v55 }
 0x15a   : > { %v3678_v0 = vpop.f32.mrf.mxu0 }
 0x15b   : > { %v941_v32 = vrot.slane %v3678_v0, 7 }
 0x15c   : > { %v799_v31 = vpop.f32.mrf.mxu0 }
 0x15d   : > { %v940_v37 = vrot.slane %v799_v31, 7 }
 0x15f   : > { %v4782_v38 = vsel %vm970_vm4, %v940_v37, %v941_v32  ;;  %v4786_v51 = vsel %vm970_vm4, %v939_v55, %v940_v37 }
 0x162   : > { %v3681_v52 = vpop.f32.mrf.mxu0 }
 0x163   : > { %v943_v3 = vrot.slane %v3681_v52, 7 }
 0x164   : > { %v809_v1 = vpop.f32.mrf.mxu0 }
 0x165   : > { %v942_v35 = vrot.slane %v809_v1, 7 }
 0x167   : > { %v4790_v36 = vsel %vm970_vm4, %v942_v35, %v943_v3  ;;  %v4794_v47 = vsel %vm970_vm4, %v941_v32, %v942_v35 }
 0x16a   : > { %v3684_v48 = vpop.f32.mrf.mxu0 }
 0x16b   : > { %v945_v61 = vrot.slane %v3684_v48, 7 }
 0x16c   : > { %v819_v60 = vpop.f32.mrf.mxu0 }
 0x16d   : > { %v944_v33 = vrot.slane %v819_v60, 7 }
 0x16f   : > { %v4798_v34 = vsel %vm970_vm4, %v944_v33, %v945_v61  ;;  %v4802_v2 = vsel %vm970_vm4, %v943_v3, %v944_v33 }
 0x172   : > { %v3687_v4 = vpop.f32.mrf.mxu0 }
 0x173   : > { %v947_v21 = vrot.slane %v3687_v4, 7 }
 0x174   : > { %v829_v39 = vpop.f32.mrf.mxu0 }
 0x175   : > { %v946_v22 = vrot.slane %v829_v39, 7 }
 0x177   : > { %v4806_v7 = vsel %vm970_vm4, %v946_v22, %v947_v21  ;;  %v4810_v15 = vsel %vm970_vm4, %v945_v61, %v946_v22 }
 0x17a   : > { %v3690_v16 = vpop.f32.mrf.mxu0 }
 0x17b   : > { %v949_v40 = vrot.slane %v3690_v16, 7 }
 0x17c   : > { %v839_v8 = vpop.f32.mrf.mxu0 }
 0x17d   : > { %v948_v42 = vrot.slane %v839_v8, 7 }
 0x17f   : > { %v4814_v43 = vsel %vm970_vm4, %v948_v42, %v949_v40  ;;  %v4818_v44 = vsel %vm970_vm4, %v947_v21, %v948_v42 }
 0x182   : > { %v3693_v45 = vpop.f32.mrf.mxu0 }
 0x183   : > { %v951_v23 = vrot.slane %v3693_v45, 7 }
 0x184   : > { %v849_v50 = vpop.f32.mrf.mxu0 }
 0x185   : > { %v950_v24 = vrot.slane %v849_v50, 7 }
 0x187   : > { %v4822_v53 = vsel %vm970_vm4, %v950_v24, %v951_v23  ;;  %v4826_v17 = vsel %vm970_vm4, %v949_v40, %v950_v24 }
 0x18a   : > { %v3696_v18 = vpop.f32.mrf.mxu0 }
 0x18b   : > { %v953_v9 = vrot.slane %v3696_v18, 7 }
 0x18c   : > { %v859_v54 = vpop.f32.mrf.mxu0 }
 0x18d   : > { %v952_v10 = vrot.slane %v859_v54, 7 }
 0x18f   : > { %v4830_v25 = vsel %vm970_vm4, %v952_v10, %v953_v9  ;;  %v4834_v26 = vsel %vm970_vm4, %v951_v23, %v952_v10 }
 0x192   : > { %v3699_v57 = vpop.f32.mrf.mxu0 }
 0x193   : > { %v955_v59 = vrot.slane %v3699_v57, 7 }
 0x194   : > { %v869_v58 = vpop.f32.mrf.mxu0 }
 0x195   : > { %v954_v62 = vrot.slane %v869_v58, 7 }
 0x197   : > { %v4838_v5 = vsel %vm970_vm4, %v954_v62, %v955_v59  ;;  %v4842_v19 = vsel %vm970_vm4, %v953_v9, %v954_v62 }
 0x19a   : > { %v3702_v20 = vpop.f32.mrf.mxu0 }
 0x19b   : > { %v957_v27 = vrot.slane %v3702_v20, 7  ;;  %v4898_v20 = vpop.f32.mrf.mxu1 }
 0x19c   : > { %v879_v6 = vpop.f32.mrf.mxu0 }
 0x19d   : > { %v956_v28 = vrot.slane %v879_v6, 7 }
 0x19f   : > { %v4846_v13 = vsel %vm970_vm4, %v956_v28, %v957_v27  ;;  %v4850_v14 = vsel %vm970_vm4, %v955_v59, %v956_v28 }
 0x1a2   : > { %v3705_v11 = vpop.f32.mrf.mxu0 }
 0x1a3   : > { %v959_v29 = vrot.slane %v3705_v11, 7 }
 0x1a4   : > { %v889_v12 = vpop.f32.mrf.mxu0 }
 0x1a5   : > { %v958_v30 = vrot.slane %v889_v12, 7 }
 0x1a7   : > { %v4854_v46 = vsel %vm970_vm4, %v958_v30, %v959_v29  ;;  %v4858_v55 = vsel %vm970_vm4, %v957_v27, %v958_v30  ;;  %v4902_v27 = vpop.f32.mrf.mxu1 }
 0x1a9   : > { %v4904_v11 = vpop.f32.mrf.mxu1 }
 0x1aa   : > { %v3708_v0 = vpop.f32.mrf.mxu0 }
 0x1ab   : > { %v961_v32 = vrot.slane %v3708_v0, 7 }
 0x1ac   : > { %v899_v31 = vpop.f32.mrf.mxu0 }
 0x1ad   : > { %v960_v37 = vrot.slane %v899_v31, 7 }
 0x1af   : > { %v4862_v52 = vsel %vm970_vm4, %v960_v37, %v961_v32  ;;  %v4866_v1 = vsel %vm970_vm4, %v959_v29, %v960_v37 }
 0x1b2   : > { %v3711_v3 = vpop.f32.mrf.mxu0 }
 0x1b3   : > { %v963_v48 = vrot.slane %v3711_v3, 7 }
 0x1b4   : > { %v909_v35 = vpop.f32.mrf.mxu0 }
 0x1b5   : > { %v962_v60 = vrot.slane %v909_v35, 7 }
 0x1b7   : > { %v4870_v61 = vsel %vm970_vm4, %v962_v60, %v963_v48  ;;  %v4874_v33 = vsel %vm970_vm4, %v961_v32, %v962_v60  ;;  %v4919_v32 = vld [vmem:[%s6018_s5] ss:$0 sm:$0xff] }
 0x1ba   : > { %v3714_v4 = vpop.f32.mrf.mxu0 }
 0x1bb   : > { %v965_v21 = vrot.slane %v3714_v4, 7 }
 0x1bc   : > { %v919_v39 = vpop.f32.mrf.mxu0 }
 0x1bd   : > { %v964_v22 = vrot.slane %v919_v39, 7 }
 0x1bf   : > { %v4878_v16 = vsel %vm970_vm4, %v964_v22, %v965_v21  ;;  %v4882_v8 = vsel %vm970_vm4, %v963_v48, %v964_v22 }
 0x1c2   : > { %v3717_v40 = vpop.f32.mrf.mxu0 }
 0x1c3   : > { %v967_v42 = vrot.slane %v3717_v40, 7  ;;  %v2031_v40 = vld [vmem:[%s6016_s3 + $0x10] sm:$0xff] }
 0x1c4   : > { %v929_v45 = vpop.f32.mrf.mxu0  ;;  %3816 = vmatprep.subr.mxu1 %v2031_v40 }
 0x1c5   : > { %v966_v50 = vrot.slane %v929_v45, 7  ;;  %v1000_v23 = vsel %vm970_vm4, %v967_v42, %v938_v56  ;;  %3817 = vmatpush3.msra.mxu1 %v2031_v40 }
 0x1c6   : > { %v3724_v24 = vpop.f32.mrf.mxu0 }
 0x1c7   : > { %v4890_v18 = vsel %vm970_vm4, %v966_v50, %v967_v42  ;;  %v4894_v54 = vsel %vm970_vm4, %v965_v21, %v966_v50  ;;  %v1076_v9 = vadd.f32 %v3724_v24, %v4778_v63  ;;  %v3413_v42 = vld [vmem:[%s6016_s3 + $0x40] sm:$0xff] }
 0x1c8   : > { %v1070_v10 = vpop.f32.mrf.mxu0  ;;  %3900 = vmatprep.subr.mxu0 %v3413_v42 }
 0x1c9   : > { %v1071_v57 = vadd.f32 %v1070_v10, %v1000_v23  ;;  %3901 = vmatpush3.msra.mxu0 %v3413_v42 }
 0x1ca   : > { %v3727_v58 = vpop.f32.mrf.mxu0 }
 0x1cc   : > { %v1080_v59 = vpop.f32.mrf.mxu0 }
 0x1cd   : > { %v1081_v49 = vadd.f32 %v1080_v59, %v4786_v51  ;;  %v4910_v51 = vpop.f32.mrf.mxu1 }
 0x1ce   : > { %v3730_v62 = vpop.f32.mrf.mxu0 }
 0x1cf   : > { %v4921_v37 = vpop.f32.mrf.mxu1  ;;  %v1096_v42 = vadd.f32 %v3730_v62, %v4790_v36 }
 0x1d0   : > { %v1090_v56 = vpop.f32.mrf.mxu0 }
 0x1d1   : > { %v4936_v45 = vpop.f32.mrf.mxu1 }
 0x1d2   : > { %v4900_v6 = vpop.f32.mrf.mxu0 }
 0x1d3   : > { %v4938_v59 = vpop.f32.mrf.mxu1 }
 0x1d4   : > { %v1100_v28 = vpop.f32.mrf.mxu0 }
 0x1d5   : > { %v4964_v40 = vpop.f32.mrf.mxu1 }
 0x1d6   : > { %v3773_v12 = vpop.f32.mrf.mxu0 }
 0x1d7   : > { %v1441_v63 = vrot.slane %v3773_v12, 1  ;;  %v1086_v12 = vadd.f32 %v3727_v58, %v4782_v38 }
 0x1d8   : > { %v4906_v29 = vpop.f32.mrf.mxu0 }
 0x1d9   : > { %v1440_v30 = vrot.slane %v4906_v29, 1 }
 0x1da   : > { %v3776_v0 = vpop.f32.mrf.mxu0 }
 0x1db   : > { %v1499_v31 = vsel %vm1470_vm5, %v1440_v30, %v1441_v63  ;;  %v1443_v48 = vrot.slane %v3776_v0, 1 }
 0x1dc   : > { %v1301_v3 = vpop.f32.mrf.mxu0  ;;  %v1501_v35 = vadd.f32 %v1499_v31, %v1071_v57 }
 0x1dd   : > { %v1442_v60 = vrot.slane %v1301_v3, 1 }
 0x1de   : > { %v3779_v4 = vpop.f32.mrf.mxu0  ;;  %v4924_v39 = vadd.f32 %v4919_v32, %v1501_v35  ;;  %v2030_v35 = vld [vmem:[%s6016_s3 + $0x8] sm:$0xff] }
 0x1df   : > { %v1497_v21 = vsel %vm1470_vm5, %v1442_v60, %v1443_v48  ;;  %v1498_v22 = vsel %vm1470_vm5, %v1441_v63, %v1442_v60  ;;  %v1445_v10 = vrot.slane %v3779_v4, 1  ;;  %v1091_v63 = vadd.f32 %v1090_v56, %v4794_v47  ;;  %3818 = vmatprep.subr.mxu1 %v2030_v35  ;;  %v3412_v56 = vld [vmem:[%s6016_s3 + $0x38] sm:$0xff]  ;;  %v2029_v60 = vld [vmem:[%s6016_s3] sm:$0xff]  ;;  %v1648_v4 = vpop.permute.xlu1 %1647 }
 0x1e0   : > { %v1311_v50 = vpop.f32.mrf.mxu0  ;;  %v1502_v23 = vadd.f32 %v1498_v22, %v1076_v9  ;;  %v1503_v24 = vadd.f32 %v1497_v21, %v1081_v49  ;;  %3902 = vmatprep.subr.mxu0 %v3412_v56  ;;  %3819 = vmatpush3.msra.mxu1 %v2030_v35  ;;  %v1643_v35 = vpop.permute.xlu0 %1642 }
 0x1e1   : > { %v1444_v57 = vrot.slane %v1311_v50, 1  ;;  %v1101_v50 = vadd.f32 %v1100_v28, %v4802_v2  ;;  %3903 = vmatpush3.msra.mxu0 %v3412_v56  ;;  %3820 = vmatprep.subr.mxu1 %v2029_v60 }
 0x1e2   : > { %v3782_v0 = vpop.f32.mrf.mxu0  ;;  %v4943_v31 = vadd.f32 %v4919_v32, %v1502_v23  ;;  %v4946_v3 = vadd.f32 %v4919_v32, %v1503_v24  ;;  %3821 = vmatpush3.msra.mxu1 %v2029_v60 }
 0x1e3   : > { %v1495_v9 = vsel %vm1470_vm5, %v1444_v57, %v1445_v10  ;;  %v1496_v49 = vsel %vm1470_vm5, %v1443_v48, %v1444_v57  ;;  %v3411_v48 = vld [vmem:[%s6016_s3 + $0x30] sm:$0xff]  ;;  %v1447_v21 = vrot.slane %v3782_v0, 1  ;;  %v4974_v0 = vpop.f32.mrf.mxu1  ;;  %v1658_v60 = vpop.permute.xlu1 %1657 }
 0x1e4   : > { %v1504_v38 = vadd.f32 %v1496_v49, %v1086_v12  ;;  %v1505_v58 = vadd.f32 %v1495_v9, %v1091_v63  ;;  %v1321_v47 = vpop.f32.mrf.mxu0  ;;  %3904 = vmatprep.subr.mxu0 %v3411_v48  ;;  %v1111_v49 = vadd.f32 %v4902_v27, %v4810_v15 }
 0x1e5   : > { %v1446_v22 = vrot.slane %v1321_v47, 1  ;;  %3905 = vmatpush3.msra.mxu0 %v3411_v48  ;;  %v4990_v27 = vpop.f32.mrf.mxu1 }
 0x1e6   : > { %v3785_v23 = vpop.f32.mrf.mxu0  ;;  %v1538_v24 = vadd.f32 %v4919_v32, %v1504_v38  ;;  %v1539_v57 = vadd.f32 %v4919_v32, %v1505_v58  ;;  %v1106_v38 = vadd.f32 %v4900_v6, %v4798_v34 }
 0x1e7   : > { %v1493_v12 = vsel %vm1470_vm5, %v1446_v22, %v1447_v21  ;;  %v1494_v63 = vsel %vm1470_vm5, %v1445_v10, %v1446_v22  ;;  %v1449_v58 = vrot.slane %v3785_v23, 1 }
 0x1e8   : > { %v1506_v9 = vadd.f32 %v1494_v63, %v1096_v42  ;;  %v1507_v36 = vadd.f32 %v1493_v12, %v1101_v50  ;;  %v1331_v62 = vpop.f32.mrf.mxu0  ;;  %v1568_v2 = vmax.f32 %v1538_v24, 0.0  ;;  %v1569_v28 = vmax.f32 %v1539_v57, 0.0  ;;  %v4998_v63 = vpop.f32.mrf.mxu1 }
 0x1e9   : > { %v1448_v10 = vrot.slane %v1331_v62, 1  ;;  %v1116_v24 = vadd.f32 %v4898_v20, %v4806_v7 }
 0x1ea   : > { %v3788_v47 = vpop.f32.mrf.mxu0  ;;  %v4980_v56 = vmul.f32 %v1643_v35, %v1568_v2  ;;  %v4982_v22 = vmul.f32 %v1648_v4, %v1569_v28  ;;  %v1541_v42 = vadd.f32 %v4919_v32, %v1507_v36  ;;  %v1540_v50 = vadd.f32 %v4919_v32, %v1506_v9 }
 0x1eb   : > { %v1491_v48 = vsel %vm1470_vm5, %v1448_v10, %v1449_v58  ;;  %v1492_v15 = vsel %vm1470_vm5, %v1447_v21, %v1448_v10  ;;  %v1451_v57 = vrot.slane %v3788_v47, 1  ;;  %v1121_v28 = vadd.f32 %v4910_v51, %v4818_v44  ;;  %v1653_v47 = vpop.permute.xlu1 %1652  ;;  %v5014_v51 = vpop.f32.mrf.mxu1 }
 0x1ec   : > { %v1508_v34 = vadd.f32 %v1492_v15, %v1106_v38  ;;  %v1509_v6 = vadd.f32 %v1491_v48, %v1111_v49  ;;  %1829 = vrot.lane.b32.xlu1 %v4980_v56, %s4098_s16  ;;  %v1341_v4 = vpop.f32.mrf.mxu0  ;;  %1831 = vrot.lane.b32.xlu0 %v4982_v22, %s4098_s16  ;;  %v1571_v23 = vmax.f32 %v1541_v42, 0.0  ;;  %v1570_v36 = vmax.f32 %v1540_v50, 0.0  ;;  %v1663_v49 = vpop.permute.xlu0 %1662 }
 0x1ed   : > { %v1450_v12 = vrot.slane %v1341_v4, 1  ;;  %v3754_v4 = vpop.f32.mrf.mxu1 }
 0x1ee   : > { %v3791_v21 = vpop.f32.mrf.mxu0  ;;  %v5000_v9 = vmul.f32 %v1658_v60, %v1571_v23  ;;  %v1542_v62 = vadd.f32 %v4919_v32, %v1508_v34  ;;  %v1543_v2 = vadd.f32 %v4919_v32, %v1509_v6  ;;  %v5017_v48 = vmul.f32 %v1653_v47, %v1570_v36 }
 0x1ef   : > { %v1489_v35 = vsel %vm1470_vm5, %v1450_v12, %v1451_v57  ;;  %v1490_v7 = vsel %vm1470_vm5, %v1449_v58, %v1450_v12  ;;  %v1126_v6 = vadd.f32 %v4904_v11, %v4814_v43  ;;  %v1453_v23 = vrot.slane %v3791_v21, 1 }
 0x1f0   : > { %v1510_v20 = vadd.f32 %v1490_v7, %v1116_v24  ;;  %v1351_v38 = vpop.f32.mrf.mxu0  ;;  %1904 = vrot.lane.b32.xlu1 %v5000_v9, %s4101_s12  ;;  %1835 = vrot.lane.b32.xlu0 %v5000_v9, %s4098_s16  ;;  %v1572_v10 = vmax.f32 %v1542_v62, 0.0  ;;  %v1511_v42 = vadd.f32 %v1489_v35, %v1121_v28  ;;  %v1573_v15 = vmax.f32 %v1543_v2, 0.0  ;;  %v1668_v12 = vpop.permute.xlu0 %1667 }
 0x1f1   : > { %v1452_v44 = vrot.slane %v1351_v38, 1  ;;  %v1131_v11 = vadd.f32 %v4936_v45, %v4826_v17  ;;  %v1673_v7 = vpop.permute.xlu1 %1672 }
 0x1f2   : > { %v1544_v50 = vadd.f32 %v4919_v32, %v1510_v20  ;;  %v3794_v60 = vpop.f32.mrf.mxu0  ;;  %v5019_v58 = vmul.f32 %v1663_v49, %v1572_v10  ;;  %v1545_v36 = vadd.f32 %v4919_v32, %v1511_v42  ;;  %v5034_v43 = vmul.f32 %v1668_v12, %v1573_v15  ;;  %v5038_v49 = vpop.f32.mrf.mxu1 }
 0x1f3   : > { %v1488_v34 = vsel %vm1470_vm5, %v1451_v57, %v1452_v44  ;;  %v1487_v2 = vsel %vm1470_vm5, %v1452_v44, %v1453_v23  ;;  %v1455_v17 = vrot.slane %v3794_v60, 1 }
 0x1f4   : > { %v1361_v24 = vpop.f32.mrf.mxu0  ;;  %1833 = vrot.lane.b32.xlu1 %v5017_v48, %s4098_s16  ;;  %1906 = vrot.lane.b32.xlu0 %v5019_v58, %s4101_s12  ;;  %v1574_v62 = vmax.f32 %v1544_v50, 0.0  ;;  %v1512_v57 = vadd.f32 %v1488_v34, %v1126_v6  ;;  %v1513_v20 = vadd.f32 %v1487_v2, %v1131_v11  ;;  %v3757_v38 = vpop.f32.mrf.mxu1  ;;  %v1575_v10 = vmax.f32 %v1545_v36, 0.0 }
 0x1f5   : > { %v1454_v21 = vrot.slane %v1361_v24, 1  ;;  %v1136_v50 = vadd.f32 %v4921_v37, %v4822_v53  ;;  %v1141_v34 = vadd.f32 %v4964_v40, %v4834_v26  ;;  %v1678_v6 = vpop.permute.xlu0 %1677  ;;  %v1146_v26 = vadd.f32 %v4938_v59, %v4830_v25  ;;  %v1683_v40 = vpop.permute.xlu1 %1682 }
 0x1f6   : > { %v5032_v28 = vpop.f32.mrf.mxu0  ;;  %v1546_v47 = vadd.f32 %v4919_v32, %v1512_v57  ;;  %v5047_v44 = vmul.f32 %v1673_v7, %v1574_v62  ;;  %v1547_v60 = vadd.f32 %v4919_v32, %v1513_v20  ;;  %v1180_v24 = vpop.f32.mrf.mxu1  ;;  %v5066_v62 = vmul.f32 %v1678_v6, %v1575_v10 }
 0x1f7   : > { %v1486_v45 = vsel %vm1470_vm5, %v1453_v23, %v1454_v21  ;;  %v1485_v23 = vsel %vm1470_vm5, %v1454_v21, %v1455_v17  ;;  %v1457_v21 = vrot.slane %v5032_v28, 1  ;;  %v5088_v25 = vadd.f32 %v5014_v51, %v4850_v14 }
 0x1f8   : > { %v1371_v35 = vpop.f32.mrf.mxu0  ;;  %1908 = vrot.lane.b32.xlu1 %v5034_v43, %s4101_s12  ;;  %1839 = vrot.lane.b32.xlu0 %v5034_v43, %s4098_s16  ;;  %v1576_v12 = vmax.f32 %v1546_v47, 0.0  ;;  %v1514_v53 = vadd.f32 %v1486_v45, %v1136_v50  ;;  %v3760_v2 = vpop.f32.mrf.mxu1  ;;  %v1515_v57 = vadd.f32 %v1485_v23, %v1141_v34  ;;  %v1156_v45 = vadd.f32 %v4974_v0, %v4838_v5 }
 0x1f9   : > { %v1456_v37 = vrot.slane %v1371_v35, 1  ;;  %v1577_v35 = vmax.f32 %v1547_v60, 0.0  ;;  %v1151_v50 = vadd.f32 %v4990_v27, %v4842_v19  ;;  %v1176_v59 = vadd.f32 %v3754_v4, %v4854_v46  ;;  %v1688_v5 = vpop.permute.xlu0 %1687 }
 0x1fa   : > { %v5045_v42 = vpop.f32.mrf.mxu0  ;;  %v1548_v7 = vadd.f32 %v4919_v32, %v1514_v53  ;;  %v5080_v47 = vmul.f32 %v1683_v40, %v1576_v12  ;;  %v1186_v28 = vadd.f32 %v3757_v38, %v4862_v52  ;;  %v1190_v34 = vpop.f32.mrf.mxu1  ;;  %v1181_v52 = vadd.f32 %v1180_v24, %v4866_v1 }
 0x1fb   : > { %v1484_v20 = vsel %vm1470_vm5, %v1455_v17, %v1456_v37  ;;  %v1549_v17 = vadd.f32 %v4919_v32, %v1515_v57  ;;  %v1483_v6 = vsel %vm1470_vm5, %v1456_v37, %v1457_v21  ;;  %v5102_v23 = vmul.f32 %v1688_v5, %v1577_v35 }
 0x1fc   : > { %v5053_v15 = vpop.f32.mrf.mxu0  ;;  %1837 = vrot.lane.b32.xlu1 %v5019_v58, %s4098_s16  ;;  %1910 = vrot.lane.b32.xlu0 %v5047_v44, %s4101_s12  ;;  %v1516_v19 = vadd.f32 %v1484_v20, %v1146_v26  ;;  %v3763_v27 = vpop.f32.mrf.mxu1  ;;  %v1578_v51 = vmax.f32 %v1548_v7, 0.0  ;;  %v1196_v12 = vadd.f32 %v3760_v2, %v4870_v61  ;;  %v1191_v53 = vadd.f32 %v1190_v34, %v4874_v33 }
 0x1fd   : > { %v1458_v4 = vrot.slane %v5053_v15, 1  ;;  %v1517_v1 = vadd.f32 %v1483_v6, %v1151_v50  ;;  %v1693_v61 = vpop.permute.xlu1 %1692  ;;  %v1579_v33 = vmax.f32 %v1549_v17, 0.0  ;;  %v1206_v6 = vadd.f32 %v3763_v27, %v4878_v16 }
 0x1fe   : > { %v5064_v36 = vpop.f32.mrf.mxu0  ;;  %v1550_v15 = vadd.f32 %v4919_v32, %v1516_v19  ;;  %v1200_v7 = vpop.f32.mrf.mxu1  ;;  %v5125_v34 = vmul.f32 %v1693_v61, %v1578_v51 }
 0x1ff   : > { %v1461_v14 = vrot.slane %v5064_v36, 1  ;;  %v1482_v20 = vsel %vm1470_vm5, %v1457_v21, %v1458_v4  ;;  %v1201_v17 = vadd.f32 %v1200_v7, %v4882_v8  ;;  %v1698_v21 = vpop.permute.xlu0 %1697  ;;  %v1551_v19 = vadd.f32 %v4919_v32, %v1517_v1 }
 0x200   : > { %v5068_v11 = vpop.f32.mrf.mxu0  ;;  %1912 = vrot.lane.b32.xlu1 %v5066_v62, %s4101_s12  ;;  %1843 = vrot.lane.b32.xlu0 %v5066_v62, %s4098_s16  ;;  %v1518_v16 = vadd.f32 %v1482_v20, %v1156_v45  ;;  %v5139_v51 = vmul.f32 %v1698_v21, %v1579_v33 }
 0x201   : > { %v1581_v33 = vmax.f32 %v1551_v19, 0.0  ;;  %v1703_v7 = vpop.permute.xlu1 %1702 }
 0x202   : > { %v3806_v10 = vpop.f32.mrf.mxu0 }
 0x203   : > { %v1463_v46 = vrot.slane %v3806_v10, 1 }
 0x204   : > { %v1401_v60 = vpop.f32.mrf.mxu0  ;;  %1841 = vrot.lane.b32.xlu1 %v5047_v44, %s4098_s16  ;;  %1914 = vrot.lane.b32.xlu0 %v5080_v47, %s4101_s12 }
 0x205   : > { %v1462_v0 = vrot.slane %v1401_v60, 1 }
 0x206   : > { %v3809_v38 = vpop.f32.mrf.mxu0 }
 0x207   : > { %v1477_v37 = vsel %vm1470_vm5, %v1462_v0, %v1463_v46  ;;  %v1478_v57 = vsel %vm1470_vm5, %v1461_v14, %v1462_v0  ;;  %v1465_v2 = vrot.slane %v3809_v38, 1  ;;  %v1459_v0 = vrot.slane %v5045_v42, 1 }
 0x208   : > { %v1522_v24 = vadd.f32 %v1478_v57, %v1176_v59  ;;  %v1523_v26 = vadd.f32 %v1477_v37, %v1181_v52  ;;  %v1411_v40 = vpop.f32.mrf.mxu0  ;;  %1916 = vrot.lane.b32.xlu1 %v5102_v23, %s4101_s12  ;;  %1847 = vrot.lane.b32.xlu0 %v5102_v23, %s4098_s16  ;;  %v1580_v57 = vmax.f32 %v1550_v15, 0.0 }
 0x209   : > { %v1464_v35 = vrot.slane %v1411_v40, 1  ;;  %v1481_v1 = vsel %vm1470_vm5, %v1458_v4, %v1459_v0 }
 0x20a   : > { %v5120_v10 = vadd.f32 %v4919_v32, %v1522_v24  ;;  %v5123_v50 = vadd.f32 %v4919_v32, %v1523_v26  ;;  %v3812_v59 = vpop.f32.mrf.mxu0  ;;  %v1460_v24 = vrot.slane %v5068_v11, 1  ;;  %v5162_v11 = vld [vmem:[%s6016_s3 + $0x28] sm:$0xff]  ;;  %v5177_v21 = vmul.f32 %v1703_v7, %v1580_v57 }
 0x20b   : > { %v1475_v60 = vsel %vm1470_vm5, %v1464_v35, %v1465_v2  ;;  %v1476_v5 = vsel %vm1470_vm5, %v1463_v46, %v1464_v35  ;;  %v1467_v8 = vrot.slane %v3812_v59, 1  ;;  %v3766_v46 = vpop.f32.mrf.mxu1  ;;  %3858 = vmatprep.subr.mxu1 %v5162_v11  ;;  %v1171_v57 = vadd.f32 %v5038_v49, %v4858_v55 }
 0x20c   : > { %v1524_v52 = vadd.f32 %v1476_v5, %v1186_v28  ;;  %v1525_v38 = vadd.f32 %v1475_v60, %v1191_v53  ;;  %v1421_v37 = vpop.f32.mrf.mxu0  ;;  %1845 = vrot.lane.b32.xlu1 %v5080_v47, %s4098_s16  ;;  %1918 = vrot.lane.b32.xlu0 %v5125_v34, %s4101_s12  ;;  %v1216_v61 = vadd.f32 %v3766_v46, %v4890_v18  ;;  %v1587_v7 = vmax.f32 %v5123_v50, 0.0 }
 0x20d   : > { %v1466_v27 = vrot.slane %v1421_v37, 1  ;;  %v1552_v18 = vadd.f32 %v4919_v32, %v1518_v16  ;;  %v1210_v59 = vpop.f32.mrf.mxu1  ;;  %v1480_v29 = vsel %vm1470_vm5, %v1459_v0, %v1460_v24 }
 0x20e   : > { %v5144_v42 = vadd.f32 %v4919_v32, %v1524_v52  ;;  %v5147_v28 = vadd.f32 %v4919_v32, %v1525_v38  ;;  %v3815_v53 = vpop.f32.mrf.mxu0  ;;  %v1166_v52 = vadd.f32 %v4998_v63, %v4846_v13  ;;  %v1479_v63 = vsel %vm1470_vm5, %v1460_v24, %v1461_v14 }
 0x20f   : > { %v1473_v45 = vsel %vm1470_vm5, %v1466_v27, %v1467_v8  ;;  %v1474_v26 = vsel %vm1470_vm5, %v1465_v2, %v1466_v27  ;;  %v1469_v40 = vrot.slane %v3815_v53, 1  ;;  %v1519_v2 = vadd.f32 %v1481_v1, %v5088_v25  ;;  %v1713_v1 = vpop.permute.xlu1 %1712 }
 0x210   : > { %v1526_v4 = vadd.f32 %v1474_v26, %v1196_v12  ;;  %v1527_v15 = vadd.f32 %v1473_v45, %v1201_v17  ;;  %v1431_v35 = vpop.f32.mrf.mxu0  ;;  %1920 = vrot.lane.b32.xlu1 %v5139_v51, %s4101_s12  ;;  %1851 = vrot.lane.b32.xlu0 %v5139_v51, %s4098_s16  ;;  %v1211_v25 = vadd.f32 %v1210_v59, %v4894_v54  ;;  %v1708_v54 = vpop.permute.xlu0 %1707  ;;  %v1582_v27 = vmax.f32 %v1552_v18, 0.0 }
 0x211   : > { %v1500_v12 = vsel %vm1470_vm5, %v1469_v40, %v1440_v30  ;;  %v1468_v20 = vrot.slane %v1431_v35, 1  ;;  %v1553_v0 = vadd.f32 %v4919_v32, %v1519_v2  ;;  %v1520_v46 = vadd.f32 %v1480_v29, %v1166_v52 }
 0x212   : > { %v5172_v17 = vadd.f32 %v4919_v32, %v1526_v4  ;;  %v5175_v60 = vadd.f32 %v4919_v32, %v1527_v15  ;;  %v1530_v5 = vadd.f32 %v1500_v12, %v1216_v61  ;;  %v5199_v13 = vmul.f32 %v1708_v54, %v1581_v33 }
 0x213   : > { %v1471_v30 = vsel %vm1470_vm5, %v1468_v20, %v1469_v40  ;;  %v1472_v19 = vsel %vm1470_vm5, %v1467_v8, %v1468_v20  ;;  %v1583_v53 = vmax.f32 %v1553_v0, 0.0  ;;  %v1521_v45 = vadd.f32 %v1479_v63, %v1171_v57  ;;  %v1723_v40 = vpop.permute.xlu1 %1722 }
 0x214   : > { %v5189_v38 = vadd.f32 %v4919_v32, %v1530_v5  ;;  %v1528_v37 = vadd.f32 %v1472_v19, %v1206_v6  ;;  %1849 = vrot.lane.b32.xlu1 %v5125_v34, %s4098_s16  ;;  %1922 = vrot.lane.b32.xlu0 %v5177_v21, %s4101_s12  ;;  %v1529_v16 = vadd.f32 %v1471_v30, %v1211_v25  ;;  %v1718_v55 = vpop.permute.xlu0 %1717  ;;  %v1586_v4 = vmax.f32 %v5120_v10, 0.0 }
 0x215   : > { %v1554_v36 = vadd.f32 %v4919_v32, %v1520_v46  ;;  %v5215_v26 = vmul.f32 %v1713_v1, %v1582_v27  ;;  %v1555_v49 = vadd.f32 %v4919_v32, %v1521_v45  ;;  %v5222_v24 = vmul.f32 %v1718_v55, %v1583_v53 }
 0x216   : > { %v5197_v8 = vadd.f32 %v4919_v32, %v1528_v37  ;;  %v5206_v6 = vadd.f32 %v4919_v32, %v1529_v16  ;;  %v1588_v18 = vmax.f32 %v5144_v42, 0.0  ;;  %v1589_v20 = vmax.f32 %v5147_v28, 0.0 }
 0x217   : > { %v1584_v14 = vmax.f32 %v1554_v36, 0.0  ;;  %v1585_v61 = vmax.f32 %v1555_v49, 0.0  ;;  %v1733_v35 = vpop.permute.xlu1 %1732  ;;  %v1590_v5 = vmax.f32 %v5172_v17, 0.0  ;;  %v1591_v30 = vmax.f32 %v5175_v60, 0.0 }
 0x218   : > { %1924 = vrot.lane.b32.xlu1 %v5199_v13, %s4101_s12  ;;  %1855 = vrot.lane.b32.xlu0 %v5199_v13, %s4098_s16  ;;  %v1728_v32 = vpop.permute.xlu0 %1727  ;;  %v5242_v2 = vmul.f32 %v1733_v35, %v1586_v4  ;;  %v1592_v52 = vmax.f32 %v5197_v8, 0.0  ;;  %v1594_v17 = vmax.f32 %v5189_v38, 0.0  ;;  %v1593_v0 = vmax.f32 %v5206_v6, 0.0 }
 0x219   : > { %v5228_v33 = vmul.f32 %v1723_v40, %v1584_v14  ;;  %v5235_v15 = vmul.f32 %v1728_v32, %v1585_v61  ;;  %v1565_v38 = vmax.f32 %v4924_v39, 0.0  ;;  %v1566_v36 = vmax.f32 %v4943_v31, 0.0 }
 0x21a   : > { %v1567_v32 = vmax.f32 %v4946_v3, 0.0 }
 0x21b   : > { %v1743_v50 = vpop.permute.xlu1 %1742 }
 0x21c   : > { %1853 = vrot.lane.b32.xlu1 %v5177_v21, %s4098_s16  ;;  %1926 = vrot.lane.b32.xlu0 %v5215_v26, %s4101_s12  ;;  %v1738_v10 = vpop.permute.xlu0 %1737  ;;  %v5256_v59 = vmul.f32 %v1743_v50, %v1588_v18 }
 0x21d   : > { %v5249_v12 = vmul.f32 %v1738_v10, %v1587_v7  ;;  %v3361_v7 = vld [vmem:[%s6016_s3 + $0x20] sm:$0xff] }
 0x21f   : > { %v1753_v29 = vpop.permute.xlu1 %1752 }
 0x220   : > { %1928 = vrot.lane.b32.xlu1 %v5222_v24, %s4101_s12  ;;  %1859 = vrot.lane.b32.xlu0 %v5222_v24, %s4098_s16  ;;  %v1748_v42 = vpop.permute.xlu0 %1747  ;;  %v1800_v28 = vmul.f32 %v1753_v29, %v1590_v5 }
 0x221   : > { %v1799_v25 = vmul.f32 %v1748_v42, %v1589_v20  ;;  %v3360_v20 = vld [vmem:[%s6016_s3 + $0x18] sm:$0xff] }
 0x223   : > { %v1763_v54 = vpop.permute.xlu1 %1762 }
 0x224   : > { %1857 = vrot.lane.b32.xlu1 %v5215_v26, %s4098_s16  ;;  %1930 = vrot.lane.b32.xlu0 %v5228_v33, %s4101_s12  ;;  %v1758_v19 = vpop.permute.xlu0 %1757  ;;  %v1802_v60 = vmul.f32 %v1763_v54, %v1592_v52 }
 0x225   : > { %v1801_v37 = vmul.f32 %v1758_v19, %v1591_v30 }
 0x227   : > { %v1773_v27 = vpop.permute.xlu1 %1772 }
 0x228   : > { %1932 = vrot.lane.b32.xlu1 %v5235_v15, %s4101_s12  ;;  %1863 = vrot.lane.b32.xlu0 %v5235_v15, %s4098_s16  ;;  %v1768_v16 = vpop.permute.xlu0 %1767  ;;  %v1804_v63 = vmul.f32 %v1773_v27, %v1594_v17 }
 0x229   : > { %v1803_v46 = vmul.f32 %v1768_v16, %v1593_v0 }
 0x22b   : > { %v1633_v57 = vpop.permute.xlu1 %1632 }
 0x22c   : > { %1861 = vrot.lane.b32.xlu1 %v5228_v33, %s4098_s16  ;;  %1934 = vrot.lane.b32.xlu0 %v5242_v2, %s4101_s12  ;;  %v1628_v8 = vpop.permute.xlu0 %1627  ;;  %v1776_v61 = vmul.f32 %v1633_v57, %v1566_v36 }
 0x22d   : > { %v1775_v45 = vmul.f32 %v1628_v8, %v1565_v38 }
 0x230   : > { %1936 = vrot.lane.b32.xlu1 %v5249_v12, %s4101_s12  ;;  %1867 = vrot.lane.b32.xlu0 %v5249_v12, %s4098_s16  ;;  %v1638_v1 = vpop.permute.xlu0 %1637 }
 0x231   : > { %v1777_v10 = vmul.f32 %v1638_v1, %v1567_v32 }
 0x234   : > { %1865 = vrot.lane.b32.xlu1 %v5242_v2, %s4098_s16  ;;  %1938 = vrot.lane.b32.xlu0 %v5256_v59, %s4101_s12 }
 0x238   : > { %1940 = vrot.lane.b32.xlu1 %v1799_v25, %s4101_s12  ;;  %1871 = vrot.lane.b32.xlu0 %v1799_v25, %s4098_s16 }
 0x23c   : > { %1869 = vrot.lane.b32.xlu1 %v5256_v59, %s4098_s16  ;;  %1942 = vrot.lane.b32.xlu0 %v1800_v28, %s4101_s12 }
 0x240   : > { %1944 = vrot.lane.b32.xlu1 %v1801_v37, %s4101_s12  ;;  %1875 = vrot.lane.b32.xlu0 %v1801_v37, %s4098_s16 }
 0x244   : > { %1873 = vrot.lane.b32.xlu1 %v1800_v28, %s4098_s16  ;;  %1946 = vrot.lane.b32.xlu0 %v1802_v60, %s4101_s12 }
 0x248   : > { %1948 = vrot.lane.b32.xlu1 %v1803_v46, %s4101_s12  ;;  %1950 = vrot.lane.b32.xlu0 %v1804_v63, %s4101_s12 }
 0x25e   : > { %v1830_v53 = vpop.permute.xlu1 %1829  ;;  %v1832_v6 = vpop.permute.xlu0 %1831 }
 0x25f   : > { %v1976_v55 = vsel %vm592_vm2, %v1775_v45, %v1830_v53  ;;  %v1977_v39 = vsel %vm592_vm2, %v1776_v61, %v1832_v6 }
 0x262   : > { %v1905_v49 = vpop.permute.xlu1 %1904  ;;  %v1836_v14 = vpop.permute.xlu0 %1835 }
 0x263   : > { %v5282_v40 = vsel %vm2000_vm6, %v1976_v55, %v1905_v49  ;;  %v1979_v5 = vsel %vm592_vm2, %v4980_v56, %v1836_v14 }
 0x264   : > { %3822 = vmatprep.mubr.msk.f32.mxu1 %vm2032_vm7, %v5282_v40  ;;  %3906 = vmatprep.mubr.msk.f32.mxu0 %vm2032_vm7, %v5282_v40 }
 0x266   : > { %v1834_v31 = vpop.permute.xlu1 %1833  ;;  %v1907_v4 = vpop.permute.xlu0 %1906 }
 0x267   : > { %v5291_v35 = vsel %vm2000_vm6, %v1977_v39, %v1907_v4  ;;  %v1978_v3 = vsel %vm592_vm2, %v1777_v10, %v1834_v31 }
 0x268   : > { %3823 = vmatmul.mubr.msk.f32.vlgmr.msra.gmra.mxu1 %vm2032_vm7, %v5291_v35  ;;  %3907 = vmatmul.mubr.msk.f32.vlgmr.msra.gmra.mxu0 %vm2032_vm7, %v5291_v35 }
 0x269   : > { %3859 = vmatpush3.msra.mxu1 %v5162_v11  ;;  %v5315_v11 = vld [vmem:[%s6017_s4] sm:$0xf] }
 0x26a   : > { %v1909_v18 = vpop.permute.xlu1 %1908  ;;  %v1840_v50 = vpop.permute.xlu0 %1839  ;;  %3860 = vmatprep.subr.mxu1 %v3361_v7 }
 0x26b   : > { %v5306_v42 = vsel %vm2000_vm6, %v1978_v3, %v1909_v18  ;;  %3861 = vmatpush3.msra.mxu1 %v3361_v7  ;;  %v1981_v37 = vsel %vm592_vm2, %v5017_v48, %v1840_v50 }
 0x26c   : > { %3825 = vmatprep.mubr.msk.f32.mxu1 %vm2032_vm7, %v5306_v42  ;;  %3909 = vmatprep.mubr.msk.f32.mxu0 %vm2032_vm7, %v5306_v42 }
 0x26d   : > { %3862 = vmatprep.subr.mxu1 %v3360_v20 }
 0x26e   : > { %v1838_v25 = vpop.permute.xlu1 %1837  ;;  %v1911_v29 = vpop.permute.xlu0 %1910  ;;  %3863 = vmatpush3.msra.mxu1 %v3360_v20 }
 0x26f   : > { %v5320_v30 = vsel %vm2000_vm6, %v1979_v5, %v1911_v29  ;;  %3942 = vmatprep.subr.msk.mxu1 %vm719_vm0, %v5315_v11  ;;  %v1980_v28 = vsel %vm592_vm2, %v4982_v22, %v1838_v25 }
 0x270   : > { %3826 = vmatmul.mubr.msk.f32.gmra.mxu1 %vm2032_vm7, %v5320_v30  ;;  %3910 = vmatmul.mubr.msk.f32.gmra.mxu0 %vm2032_vm7, %v5320_v30 }
 0x272   : > { %v1913_v19 = vpop.permute.xlu1 %1912  ;;  %v1844_v56 = vpop.permute.xlu0 %1843 }
 0x273   : > { %v5331_v52 = vsel %vm2000_vm6, %v1980_v28, %v1913_v19  ;;  %v1983_v48 = vsel %vm592_vm2, %v5019_v58, %v1844_v56 }
 0x274   : > { %3828 = vmatprep.mubr.msk.f32.mxu1 %vm2032_vm7, %v5331_v52  ;;  %3912 = vmatprep.mubr.msk.f32.mxu0 %vm2032_vm7, %v5331_v52 }
 0x276   : > { %v1842_v54 = vpop.permute.xlu1 %1841  ;;  %v1915_v17 = vpop.permute.xlu0 %1914 }
 0x277   : > { %v5340_v0 = vsel %vm2000_vm6, %v1981_v37, %v1915_v17  ;;  %v1982_v22 = vsel %vm592_vm2, %v5000_v9, %v1842_v54 }
 0x278   : > { %3829 = vmatmul.mubr.msk.f32.gmra.mxu1 %vm2032_vm7, %v5340_v0  ;;  %3913 = vmatmul.mubr.msk.f32.gmra.mxu0 %vm2032_vm7, %v5340_v0 }
 0x27a   : > { %v1917_v60 = vpop.permute.xlu1 %1916  ;;  %v1848_v16 = vpop.permute.xlu0 %1847 }
 0x27b   : > { %v5349_v27 = vsel %vm2000_vm6, %v1982_v22, %v1917_v60  ;;  %v1985_v58 = vsel %vm592_vm2, %v5047_v44, %v1848_v16 }
 0x27c   : > { %3831 = vmatprep.mubr.msk.f32.mxu1 %vm2032_vm7, %v5349_v27  ;;  %3915 = vmatprep.mubr.msk.f32.mxu0 %vm2032_vm7, %v5349_v27 }
 0x27e   : > { %v1846_v46 = vpop.permute.xlu1 %1845  ;;  %v1919_v63 = vpop.permute.xlu0 %1918 }
 0x27f   : > { %v5358_v8 = vsel %vm2000_vm6, %v1983_v48, %v1919_v63  ;;  %v1984_v9 = vsel %vm592_vm2, %v5034_v43, %v1846_v46 }
 0x280   : > { %3832 = vmatmul.mubr.msk.f32.gmra.mxu1 %vm2032_vm7, %v5358_v8  ;;  %3916 = vmatmul.mubr.msk.f32.gmra.mxu0 %vm2032_vm7, %v5358_v8 }
 0x282   : > { %v1921_v57 = vpop.permute.xlu1 %1920  ;;  %v1852_v1 = vpop.permute.xlu0 %1851 }
 0x283   : > { %v5367_v38 = vsel %vm2000_vm6, %v1984_v9, %v1921_v57  ;;  %v1987_v44 = vsel %vm592_vm2, %v5080_v47, %v1852_v1 }
 0x284   : > { %3834 = vmatprep.mubr.msk.f32.mxu1 %vm2032_vm7, %v5367_v38  ;;  %3918 = vmatprep.mubr.msk.f32.mxu0 %vm2032_vm7, %v5367_v38 }
 0x286   : > { %v1850_v53 = vpop.permute.xlu1 %1849  ;;  %v1923_v6 = vpop.permute.xlu0 %1922 }
 0x287   : > { %v5376_v45 = vsel %vm2000_vm6, %v1985_v58, %v1923_v6  ;;  %v1986_v43 = vsel %vm592_vm2, %v5066_v62, %v1850_v53 }
 0x288   : > { %3835 = vmatmul.mubr.msk.f32.gmra.mxu1 %vm2032_vm7, %v5376_v45  ;;  %3919 = vmatmul.mubr.msk.f32.gmra.mxu0 %vm2032_vm7, %v5376_v45 }
 0x28a   : > { %v1925_v36 = vpop.permute.xlu1 %1924  ;;  %v1856_v55 = vpop.permute.xlu0 %1855 }
 0x28b   : > { %v5385_v49 = vsel %vm2000_vm6, %v1986_v43, %v1925_v36  ;;  %v1989_v47 = vsel %vm592_vm2, %v5125_v34, %v1856_v55 }
 0x28c   : > { %3837 = vmatprep.mubr.msk.f32.mxu1 %vm2032_vm7, %v5385_v49  ;;  %3921 = vmatprep.mubr.msk.f32.mxu0 %vm2032_vm7, %v5385_v49 }
 0x28e   : > { %v1854_v14 = vpop.permute.xlu1 %1853  ;;  %v1927_v61 = vpop.permute.xlu0 %1926 }
 0x28f   : > { %v5394_v32 = vsel %vm2000_vm6, %v1987_v44, %v1927_v61  ;;  %v1988_v62 = vsel %vm592_vm2, %v5102_v23, %v1854_v14  ;;  %v4048_v14 = vld [vmem:[%s4188_s15 + $0xa0] sm:$0xff]  ;;  %v4049_v61 = vld [vmem:[%s4188_s15 + $0xa8] sm:$0xff] }
 0x290   : > { %3838 = vmatmul.mubr.msk.f32.gmra.mxu1 %vm2032_vm7, %v5394_v32  ;;  %3922 = vmatmul.mubr.msk.f32.gmra.mxu0 %vm2032_vm7, %v5394_v32 }
 0x292   : > { %v1929_v39 = vpop.permute.xlu1 %1928  ;;  %v1860_v31 = vpop.permute.xlu0 %1859 }
 0x293   : > { %v5403_v4 = vsel %vm2000_vm6, %v1988_v62, %v1929_v39  ;;  %v1991_v34 = vsel %vm592_vm2, %v5177_v21, %v1860_v31  ;;  %v4051_v62 = vld [vmem:[%s4188_s15 + $0xb8] sm:$0xff]  ;;  %v4052_v39 = vld [vmem:[%s4188_s15 + $0xc0] sm:$0xff]  ;;  %v4053_v31 = vld [vmem:[%s4188_s15 + $0xc8] sm:$0xff] }
 0x294   : > { %3840 = vmatprep.mubr.msk.f32.mxu1 %vm2032_vm7, %v5403_v4  ;;  %3924 = vmatprep.mubr.msk.f32.mxu0 %vm2032_vm7, %v5403_v4 }
 0x296   : > { %v1858_v7 = vpop.permute.xlu1 %1857  ;;  %v1931_v10 = vpop.permute.xlu0 %1930 }
 0x297   : > { %v5412_v3 = vsel %vm2000_vm6, %v1989_v47, %v1931_v10  ;;  %v1990_v23 = vsel %vm592_vm2, %v5139_v51, %v1858_v7  ;;  %v4055_v47 = vld [vmem:[%s4188_s15 + $0xd8] sm:$0xff]  ;;  %v4056_v7 = vld [vmem:[%s4188_s15 + $0xe0] sm:$0xff]  ;;  %v4057_v10 = vld [vmem:[%s4188_s15 + $0xe8] sm:$0xff] }
 0x298   : > { %3841 = vmatmul.mubr.msk.f32.gmra.mxu1 %vm2032_vm7, %v5412_v3  ;;  %3925 = vmatmul.mubr.msk.f32.gmra.mxu0 %vm2032_vm7, %v5412_v3 }
 0x29a   : > { %v1933_v18 = vpop.permute.xlu1 %1932  ;;  %v1864_v50 = vpop.permute.xlu0 %1863 }
 0x29b   : > { %v5421_v20 = vsel %vm2000_vm6, %v1990_v23, %v1933_v18  ;;  %v1993_v21 = vsel %vm592_vm2, %v5215_v26, %v1864_v50 }
 0x29c   : > { %3843 = vmatprep.mubr.msk.f32.mxu1 %vm2032_vm7, %v5421_v20  ;;  %3927 = vmatprep.mubr.msk.f32.mxu0 %vm2032_vm7, %v5421_v20 }
 0x29e   : > { %v1862_v5 = vpop.permute.xlu1 %1861  ;;  %v1935_v25 = vpop.permute.xlu0 %1934 }
 0x29f   : > { %v5430_v29 = vsel %vm2000_vm6, %v1991_v34, %v1935_v25  ;;  %v1992_v51 = vsel %vm592_vm2, %v5199_v13, %v1862_v5 }
 0x2a0   : > { %3844 = vmatmul.mubr.msk.f32.gmra.mxu1 %vm2032_vm7, %v5430_v29  ;;  %3928 = vmatmul.mubr.msk.f32.gmra.mxu0 %vm2032_vm7, %v5430_v29 }
 0x2a2   : > { %v1937_v28 = vpop.permute.xlu1 %1936  ;;  %v1868_v19 = vpop.permute.xlu0 %1867 }
 0x2a3   : > { %v2017_v56 = vsel %vm2000_vm6, %v1992_v51, %v1937_v28  ;;  %v1995_v26 = vsel %vm592_vm2, %v5228_v33, %v1868_v19 }
 0x2a4   : > { %3846 = vmatprep.mubr.msk.f32.mxu1 %vm2032_vm7, %v2017_v56  ;;  %3930 = vmatprep.mubr.msk.f32.mxu0 %vm2032_vm7, %v2017_v56 }
 0x2a6   : > { %v1866_v37 = vpop.permute.xlu1 %1865  ;;  %v1939_v54 = vpop.permute.xlu0 %1938 }
 0x2a7   : > { %v2018_v17 = vsel %vm2000_vm6, %v1993_v21, %v1939_v54  ;;  %v1994_v13 = vsel %vm592_vm2, %v5222_v24, %v1866_v37 }
 0x2a8   : > { %3847 = vmatmul.mubr.msk.f32.gmra.mxu1 %vm2032_vm7, %v2018_v17  ;;  %3931 = vmatmul.mubr.msk.f32.gmra.mxu0 %vm2032_vm7, %v2018_v17 }
 0x2aa   : > { %v1941_v22 = vpop.permute.xlu1 %1940  ;;  %v1872_v60 = vpop.permute.xlu0 %1871 }
 0x2ab   : > { %v2019_v16 = vsel %vm2000_vm6, %v1994_v13, %v1941_v22  ;;  %v1997_v33 = vsel %vm592_vm2, %v5242_v2, %v1872_v60 }
 0x2ac   : > { %3849 = vmatprep.mubr.msk.f32.mxu1 %vm2032_vm7, %v2019_v16  ;;  %3933 = vmatprep.mubr.msk.f32.mxu0 %vm2032_vm7, %v2019_v16 }
 0x2ae   : > { %v1870_v48 = vpop.permute.xlu1 %1869  ;;  %v1943_v46 = vpop.permute.xlu0 %1942 }
 0x2af   : > { %v2020_v63 = vsel %vm2000_vm6, %v1995_v26, %v1943_v46  ;;  %v1996_v24 = vsel %vm592_vm2, %v5235_v15, %v1870_v48 }
 0x2b0   : > { %3850 = vmatmul.mubr.msk.f32.gmra.mxu1 %vm2032_vm7, %v2020_v63  ;;  %3934 = vmatmul.mubr.msk.f32.gmra.mxu0 %vm2032_vm7, %v2020_v63 }
 0x2b2   : > { %v1945_v9 = vpop.permute.xlu1 %1944  ;;  %v1876_v57 = vpop.permute.xlu0 %1875 }
 0x2b3   : > { %v2021_v1 = vsel %vm2000_vm6, %v1996_v24, %v1945_v9  ;;  %v1999_v15 = vsel %vm592_vm2, %v5256_v59, %v1876_v57  ;;  %v4035_v59 = vld [vmem:[%s4188_s15 + $0x38] sm:$0xff] }
 0x2b4   : > { %3852 = vmatprep.mubr.msk.f32.mxu1 %vm2032_vm7, %v2021_v1  ;;  %3936 = vmatprep.mubr.msk.f32.mxu0 %vm2032_vm7, %v2021_v1 }
 0x2b6   : > { %v1874_v58 = vpop.permute.xlu1 %1873  ;;  %v1947_v53 = vpop.permute.xlu0 %1946 }
 0x2b7   : > { %v2022_v6 = vsel %vm2000_vm6, %v1997_v33, %v1947_v53  ;;  %v1998_v43 = vsel %vm592_vm2, %v5249_v12, %v1874_v58  ;;  %v4034_v12 = vld [vmem:[%s4188_s15 + $0x30] sm:$0xff] }
 0x2b8   : > { %3853 = vmatmul.mubr.msk.f32.gmra.mxu1 %vm2032_vm7, %v2022_v6  ;;  %3937 = vmatmul.mubr.msk.f32.gmra.mxu0 %vm2032_vm7, %v2022_v6 }
 0x2ba   : > { %v1949_v36 = vpop.permute.xlu1 %1948  ;;  %v1951_v55 = vpop.permute.xlu0 %1950 }
 0x2bb   : > { %v2023_v44 = vsel %vm2000_vm6, %v1998_v43, %v1949_v36  ;;  %v2024_v2 = vsel %vm2000_vm6, %v1999_v15, %v1951_v55 }
 0x2bc   : > { %3855 = vmatprep.mubr.msk.f32.mxu1 %vm2032_vm7, %v2023_v44  ;;  %3939 = vmatprep.mubr.msk.f32.mxu0 %vm2032_vm7, %v2023_v44 }
 0x2bd   : > { %3856 = vmatmul.mubr.msk.f32.gmra.mxu1 %vm2032_vm7, %v2024_v2  ;;  %3940 = vmatmul.mubr.msk.f32.gmra.mxu0 %vm2032_vm7, %v2024_v2 }
 0x2be   : > { %3864 = vmatprep.mubr.msk.f32.mxu1 %vm2032_vm7, %v5282_v40  ;;  %v4036_v40 = vld [vmem:[%s4188_s15 + $0x40] sm:$0xff] }
 0x2c1   : > { %3865 = vmatmul.mubr.msk.f32.vlgmr.msra.gmra.mxu1 %vm2032_vm7, %v5291_v35  ;;  %v4037_v35 = vld [vmem:[%s4188_s15 + $0x48] sm:$0xff] }
 0x2c2   : > { %3943 = vmatpush3.msk.msra.mxu1 %vm719_vm0, %v5315_v11  ;;  %3867 = vmatprep.mubr.msk.f32.mxu1 %vm2032_vm7, %v5306_v42  ;;  %v4038_v42 = vld [vmem:[%s4188_s15 + $0x50] sm:$0xff]  ;;  %v4039_v11 = vld [vmem:[%s4188_s15 + $0x58] sm:$0xff] }
 0x2c5   : > { %3868 = vmatmul.mubr.msk.f32.gmra.mxu1 %vm2032_vm7, %v5320_v30  ;;  %v4040_v30 = vld [vmem:[%s4188_s15 + $0x60] sm:$0xff] }
 0x2c6   : > { %3870 = vmatprep.mubr.msk.f32.mxu1 %vm2032_vm7, %v5331_v52  ;;  %v4041_v52 = vld [vmem:[%s4188_s15 + $0x68] sm:$0xff] }
 0x2c9   : > { %3871 = vmatmul.mubr.msk.f32.gmra.mxu1 %vm2032_vm7, %v5340_v0  ;;  %v4042_v0 = vld [vmem:[%s4188_s15 + $0x70] sm:$0xff] }
 0x2ca   : > { %3873 = vmatprep.mubr.msk.f32.mxu1 %vm2032_vm7, %v5349_v27  ;;  %v4043_v27 = vld [vmem:[%s4188_s15 + $0x78] sm:$0xff] }
 0x2cd   : > { %3874 = vmatmul.mubr.msk.f32.gmra.mxu1 %vm2032_vm7, %v5358_v8  ;;  %v4044_v8 = vld [vmem:[%s4188_s15 + $0x80] sm:$0xff] }
 0x2ce   : > { %3876 = vmatprep.mubr.msk.f32.mxu1 %vm2032_vm7, %v5367_v38  ;;  %v4045_v38 = vld [vmem:[%s4188_s15 + $0x88] sm:$0xff] }
 0x2d1   : > { %3877 = vmatmul.mubr.msk.f32.gmra.mxu1 %vm2032_vm7, %v5376_v45  ;;  %v4046_v45 = vld [vmem:[%s4188_s15 + $0x90] sm:$0xff] }
 0x2d2   : > { %3879 = vmatprep.mubr.msk.f32.mxu1 %vm2032_vm7, %v5385_v49  ;;  %v4047_v49 = vld [vmem:[%s4188_s15 + $0x98] sm:$0xff] }
 0x2d5   : > { %3880 = vmatmul.mubr.msk.f32.gmra.mxu1 %vm2032_vm7, %v5394_v32  ;;  %v4050_v32 = vld [vmem:[%s4188_s15 + $0xb0] sm:$0xff] }
 0x2d6   : > { %3882 = vmatprep.mubr.msk.f32.mxu1 %vm2032_vm7, %v5403_v4  ;;  %v4054_v4 = vld [vmem:[%s4188_s15 + $0xd0] sm:$0xff]  ;;  %s299_s15 = smul.u32 24, %s4080_s21 }
 0x2d7   : > { %s3987_s21 = smul.u32 48, %s6062_s22 }
 0x2d8   : > { %p5711_p7 = scmp.lt.s32.totalorder %s299_s15, 47 }
 0x2d9   : > { %3883 = vmatmul.mubr.msk.f32.gmra.mxu1 %vm2032_vm7, %v5412_v3 }
 0x2da   : > { %3885 = vmatprep.mubr.msk.f32.mxu1 %vm2032_vm7, %v5421_v20  ;;  %s6064_s15 = smov (!%p5711_p7, %s299_s15), 47 }
 0x2db   : > { %s5773_s22 = sadd.s32 %s3987_s21, %s6064_s15 }
 0x2dc   : > { %s3261_s8 = sshll.u32 %s5773_s22, 3 }
 0x2dd   : > { %3886 = vmatmul.mubr.msk.f32.gmra.mxu1 %vm2032_vm7, %v5430_v29  ;;  %s5819_s13 = scalar_lea.vmem %s6019_s6, %s3261_s8 }
 0x2de   : > { %3888 = vmatprep.mubr.msk.f32.mxu1 %vm2032_vm7, %v2017_v56 }
 0x2e1   : > { %3889 = vmatmul.mubr.msk.f32.gmra.mxu1 %vm2032_vm7, %v2018_v17 }
 0x2e2   : > { %3891 = vmatprep.mubr.msk.f32.mxu1 %vm2032_vm7, %v2019_v16 }
 0x2e5   : > { %3892 = vmatmul.mubr.msk.f32.gmra.mxu1 %vm2032_vm7, %v2020_v63 }
 0x2e6   : > { %3894 = vmatprep.mubr.msk.f32.mxu1 %vm2032_vm7, %v2021_v1 }
 0x2e9   : > { %3895 = vmatmul.mubr.msk.f32.gmra.mxu1 %vm2032_vm7, %v2022_v6 }
 0x2ea   : > { %3897 = vmatprep.mubr.msk.f32.mxu1 %vm2032_vm7, %v2023_v44 }
 0x2ed   : > { %3898 = vmatmul.mubr.msk.f32.gmra.mxu1 %vm2032_vm7, %v2024_v2 }
 0x2ee   : > { %3944 = vmatprep.mubr.msk.f32.mxu1 %vm561_vm1, %v4034_v12 }
 0x2f1   : > { %3945 = vmatmul.mubr.msk.f32.vlgmr.msra.gmra.mxu1 %vm561_vm1, %v4035_v59 }
 0x2f2   : > { %3947 = vmatprep.mubr.msk.f32.mxu1 %vm561_vm1, %v4036_v40 }
 0x2f5   : > { %3948 = vmatmul.mubr.msk.f32.gmra.mxu1 %vm561_vm1, %v4037_v35 }
 0x2f6   : > { %3950 = vmatprep.mubr.msk.f32.mxu1 %vm561_vm1, %v4038_v42 }
 0x2f9   : > { %3951 = vmatmul.mubr.msk.f32.gmra.mxu1 %vm561_vm1, %v4039_v11 }
 0x2fa   : > { %3953 = vmatprep.mubr.msk.f32.mxu1 %vm561_vm1, %v4040_v30 }
 0x2fd   : > { %3954 = vmatmul.mubr.msk.f32.gmra.mxu1 %vm561_vm1, %v4041_v52 }
 0x2fe   : > { %3956 = vmatprep.mubr.msk.f32.mxu1 %vm561_vm1, %v4042_v0 }
 0x301   : > { %3957 = vmatmul.mubr.msk.f32.gmra.mxu1 %vm561_vm1, %v4043_v27 }
 0x302   : > { %3959 = vmatprep.mubr.msk.f32.mxu1 %vm561_vm1, %v4044_v8 }
 0x305   : > { %3960 = vmatmul.mubr.msk.f32.gmra.mxu1 %vm561_vm1, %v4045_v38 }
 0x306   : > { %3962 = vmatprep.mubr.msk.f32.mxu1 %vm561_vm1, %v4046_v45 }
 0x309   : > { %3963 = vmatmul.mubr.msk.f32.gmra.mxu1 %vm561_vm1, %v4047_v49 }
 0x30a   : > { %3965 = vmatprep.mubr.msk.f32.mxu1 %vm561_vm1, %v4048_v14 }
 0x30d   : > { %3966 = vmatmul.mubr.msk.f32.gmra.mxu1 %vm561_vm1, %v4049_v61 }
 0x30e   : > { %3968 = vmatprep.mubr.msk.f32.mxu1 %vm561_vm1, %v4050_v32 }
 0x311   : > { %3969 = vmatmul.mubr.msk.f32.gmra.mxu1 %vm561_vm1, %v4051_v62 }
 0x312   : > { %3971 = vmatprep.mubr.msk.f32.mxu1 %vm561_vm1, %v4052_v39 }
 0x315   : > { %3972 = vmatmul.mubr.msk.f32.gmra.mxu1 %vm561_vm1, %v4053_v31 }
 0x316   : > { %3974 = vmatprep.mubr.msk.f32.mxu1 %vm561_vm1, %v4054_v4 }
 0x319   : > { %3975 = vmatmul.mubr.msk.f32.gmra.mxu1 %vm561_vm1, %v4055_v47 }
 0x31a   : > { %3977 = vmatprep.mubr.msk.f32.mxu1 %vm561_vm1, %v4056_v7 }
 0x31d   : > { %3978 = vmatmul.mubr.msk.f32.gmra.mxu1 %vm561_vm1, %v4057_v10 }
 0x328   : > { %v3824_v3 = vpop.f32.mrf.mxu1 }
 0x329   : > { %v2291_v18 = vrot.slane %v3824_v3, 7 }
 0x32a   : > { %v5566_v23 = vpop.f32.mrf.mxu1 }
 0x32b   : > { %v6021_v50 = vrot.slane %v5566_v23, 7 }
 0x32d   : > { %v5573_v20 = vsel %vm970_vm4, %v6021_v50, %v2291_v18 }
 0x330   : > { %v3827_v34 = vpop.f32.mrf.mxu1 }
 0x331   : > { %v2293_v25 = vrot.slane %v3827_v34, 7 }
 0x332   : > { %v2181_v5 = vpop.f32.mrf.mxu1 }
 0x333   : > { %v2292_v29 = vrot.slane %v2181_v5, 7  ;;  %v3908_v5 = vpop.f32.mrf.mxu0 }
 0x334   : > { %v2713_v50 = vrot.slane %v3908_v5, 1 }
 0x335   : > { %v5577_v51 = vsel %vm970_vm4, %v2292_v29, %v2293_v25  ;;  %v5581_v28 = vsel %vm970_vm4, %v2291_v18, %v2292_v29 }
 0x338   : > { %v3830_v19 = vpop.f32.mrf.mxu1 }
 0x339   : > { %v2295_v21 = vrot.slane %v3830_v19, 7 }
 0x33a   : > { %v2191_v56 = vpop.f32.mrf.mxu1 }
 0x33b   : > { %v2294_v37 = vrot.slane %v2191_v56, 7  ;;  %v5660_v56 = vpop.f32.mrf.mxu0 }
 0x33c   : > { %6029 = vst [vmem:[#allocation7_spill] sm:$0xff] %v5660_v56  ;;  %v6036_v5 = vrot.slane %v5660_v56, 1 }
 0x33d   : > { %v5585_v54 = vsel %vm970_vm4, %v2294_v37, %v2295_v21  ;;  %v5589_v17 = vsel %vm970_vm4, %v2293_v25, %v2294_v37 }
 0x340   : > { %v3833_v13 = vpop.f32.mrf.mxu1 }
 0x341   : > { %v2297_v60 = vrot.slane %v3833_v13, 7  ;;  %v3911_v13 = vpop.f32.mrf.mxu0 }
 0x342   : > { %v2201_v22 = vpop.f32.mrf.mxu1 }
 0x343   : > { %v2296_v16 = vrot.slane %v2201_v22, 7 }
 0x345   : > { %v5593_v26 = vsel %vm970_vm4, %v2296_v16, %v2297_v60  ;;  %v5597_v48 = vsel %vm970_vm4, %v2295_v21, %v2296_v16  ;;  %v2603_v16 = vpop.f32.mrf.mxu0 }
 0x348   : > { %v3836_v46 = vpop.f32.mrf.mxu1 }
 0x349   : > { %v2299_v24 = vrot.slane %v3836_v46, 7 }
 0x34a   : > { %v2211_v63 = vpop.f32.mrf.mxu1 }
 0x34b   : > { %v2298_v9 = vrot.slane %v2211_v63, 7  ;;  %v5670_v63 = vpop.f32.mrf.mxu0 }
 0x34d   : > { %v5601_v57 = vsel %vm970_vm4, %v2298_v9, %v2299_v24  ;;  %v5605_v1 = vsel %vm970_vm4, %v2297_v60, %v2298_v9 }
 0x350   : > { %v3839_v33 = vpop.f32.mrf.mxu1 }
 0x351   : > { %v2301_v53 = vrot.slane %v3839_v33, 7  ;;  %v2613_v33 = vpop.f32.mrf.mxu0 }
 0x352   : > { %v2221_v58 = vpop.f32.mrf.mxu1 }
 0x353   : > { %v2300_v6 = vrot.slane %v2221_v58, 7 }
 0x355   : > { %v5609_v15 = vsel %vm970_vm4, %v2300_v6, %v2301_v53  ;;  %v5613_v43 = vsel %vm970_vm4, %v2299_v24, %v2300_v6 }
 0x358   : > { %v3842_v36 = vpop.f32.mrf.mxu1 }
 0x359   : > { %v2303_v44 = vrot.slane %v3842_v36, 7 }
 0x35a   : > { %v2231_v55 = vpop.f32.mrf.mxu1 }
 0x35b   : > { %v2302_v2 = vrot.slane %v2231_v55, 7 }
 0x35d   : > { %v5617_v12 = vsel %vm970_vm4, %v2302_v2, %v2303_v44  ;;  %v5621_v59 = vsel %vm970_vm4, %v2301_v53, %v2302_v2  ;;  %v3917_v53 = vpop.f32.mrf.mxu0 }
 0x35f   : > { %v2623_v55 = vpop.f32.mrf.mxu0 }
 0x360   : > { %v3845_v40 = vpop.f32.mrf.mxu1 }
 0x361   : > { %v2305_v42 = vrot.slane %v3845_v40, 7  ;;  %v5684_v2 = vpop.f32.mrf.mxu0 }
 0x362   : > { %v2241_v35 = vpop.f32.mrf.mxu1 }
 0x363   : > { %v2304_v11 = vrot.slane %v2241_v35, 7 }
 0x365   : > { %v5625_v30 = vsel %vm970_vm4, %v2304_v11, %v2305_v42  ;;  %v5629_v52 = vsel %vm970_vm4, %v2303_v44, %v2304_v11 }
 0x368   : > { %v3848_v0 = vpop.f32.mrf.mxu1 }
 0x369   : > { %v2307_v8 = vrot.slane %v3848_v0, 7 }
 0x36a   : > { %v2251_v27 = vpop.f32.mrf.mxu1 }
 0x36b   : > { %v2306_v38 = vrot.slane %v2251_v27, 7 }
 0x36d   : > { %v5633_v45 = vsel %vm970_vm4, %v2306_v38, %v2307_v8  ;;  %v5637_v49 = vsel %vm970_vm4, %v2305_v42, %v2306_v38  ;;  %v2633_v42 = vpop.f32.mrf.mxu0 }
 0x36f   : > { %v5692_v0 = vpop.f32.mrf.mxu0 }
 0x370   : > { %v3851_v14 = vpop.f32.mrf.mxu1 }
 0x371   : > { %v2309_v32 = vrot.slane %v3851_v14, 7  ;;  %v5698_v38 = vpop.f32.mrf.mxu0 }
 0x372   : > { %v2261_v61 = vpop.f32.mrf.mxu1 }
 0x373   : > { %v2308_v62 = vrot.slane %v2261_v61, 7  ;;  %v5702_v61 = vpop.f32.mrf.mxu0 }
 0x375   : > { %v5641_v39 = vsel %vm970_vm4, %v2308_v62, %v2309_v32  ;;  %v5645_v31 = vsel %vm970_vm4, %v2307_v8, %v2308_v62 }
 0x376   : > { %6024 = vst [vmem:[#allocation2_spill] sm:$0xff] %v5641_v39  ;;  %6025 = vst [vmem:[#allocation3_spill] sm:$0xff] %v5645_v31  ;;  %v2715_v31 = vrot.slane %v3911_v13, 1  ;;  %v2722_v13 = vrot.slane %v5698_v38, 1 }
 0x378   : > { %v3854_v4 = vpop.f32.mrf.mxu1 }
 0x379   : > { %v2311_v7 = vrot.slane %v3854_v4, 7 }
 0x37a   : > { %v2271_v47 = vpop.f32.mrf.mxu1 }
 0x37b   : > { %v2310_v10 = vrot.slane %v2271_v47, 7 }
 0x37d   : > { %v5647_v3 = vpop.f32.mrf.mxu1  ;;  %v5651_v18 = vsel %vm970_vm4, %v2310_v10, %v2311_v7  ;;  %v5655_v34 = vsel %vm970_vm4, %v2309_v32, %v2310_v10  ;;  %v2714_v10 = vrot.slane %v2603_v16, 1  ;;  %v2718_v16 = vrot.slane %v2623_v55, 1 }
 0x37e   : > { %6026 = vst [vmem:[#allocation4_spill] sm:$0xff] %v5651_v18  ;;  %6027 = vst [vmem:[#allocation5_spill] sm:$0xff] %v5655_v34  ;;  %v6034_v34 = vrot.slane %v5566_v23, 7  ;;  %v6035_v47 = vrot.slane %v5647_v3, 7  ;;  %v2717_v23 = vrot.slane %v5670_v63, 1  ;;  %v2721_v63 = vrot.slane %v5684_v2, 1 }
 0x37f   : > { %v5657_v25 = vpop.f32.mrf.mxu1 }
 0x380   : > { %6028 = vst [vmem:[#allocation6_spill] sm:$0xff] %v5657_v25  ;;  %v6020_v29 = vrot.slane %v5657_v25, 7  ;;  %v2337_v18 = vsel %vm970_vm4, %v6035_v47, %v6034_v34 }
 0x381   : > { %v3866_v19 = vpop.f32.mrf.mxu1 }
 0x382   : > { %v5666_v21 = vsel %vm970_vm4, %v2311_v7, %v6020_v29  ;;  %v2653_v7 = vpop.f32.mrf.mxu0  ;;  %v2410_v62 = vadd.f32 %v3866_v19, %v5573_v20  ;;  %v2757_v20 = vsel %vm1470_vm5, %v2713_v50, %v2714_v10 }
 0x383   : > { %6030 = vst [vmem:[#allocation8_spill] sm:$0xff] %v5666_v21  ;;  %v2404_v37 = vpop.f32.mrf.mxu1  ;;  %v2716_v21 = vrot.slane %v2613_v33, 1  ;;  %v2758_v33 = vsel %vm1470_vm5, %v6036_v5, %v2713_v50  ;;  %v5750_v50 = vld [vmem:[%s6018_s5 + $0x1] ss:$0 sm:$0xff]  ;;  %v2724_v38 = vrot.slane %v2653_v7, 1 }
 0x384   : > { %v5717_v25 = vpop.f32.mrf.mxu0  ;;  %v5778_v7 = vld [vmem:[%s6018_s5 + $0x2] ss:$0 sm:$0xff] }
 0x385   : > { %v3869_v22 = vpop.f32.mrf.mxu1  ;;  %v2755_v47 = vsel %vm1470_vm5, %v2715_v31, %v2716_v21 }
 0x386   : > { %v2420_v34 = vadd.f32 %v3869_v22, %v5577_v51  ;;  %v2663_v55 = vpop.f32.mrf.mxu0 }
 0x387   : > { %v2414_v60 = vpop.f32.mrf.mxu1 }
 0x388   : > { %v2415_v22 = vadd.f32 %v2414_v60, %v5581_v28 }
 0x389   : > { %v5668_v46 = vpop.f32.mrf.mxu1 }
 0x38a   : > { %v2430_v28 = vadd.f32 %v5668_v46, %v5585_v54  ;;  %v2727_v46 = vrot.slane %v5717_v25, 1 }
 0x38b   : > { %v5672_v24 = vpop.f32.mrf.mxu1 }
 0x38d   : > { %v5674_v9 = vpop.f32.mrf.mxu1 }
 0x38f   : > { %v5676_v58 = vpop.f32.mrf.mxu1 }
 0x391   : > { %v5678_v6 = vpop.f32.mrf.mxu1 }
 0x393   : > { %v5680_v36 = vpop.f32.mrf.mxu1 }
 0x395   : > { %v5682_v44 = vpop.f32.mrf.mxu1 }
 0x397   : > { %v5686_v40 = vpop.f32.mrf.mxu1 }
 0x399   : > { %v5688_v35 = vpop.f32.mrf.mxu1 }
 0x39b   : > { %v5690_v11 = vpop.f32.mrf.mxu1 }
 0x39d   : > { %v5694_v27 = vpop.f32.mrf.mxu1 }
 0x39f   : > { %v5696_v8 = vpop.f32.mrf.mxu1 }
 0x3a1   : > { %v5700_v14 = vpop.f32.mrf.mxu1 }
 0x3a3   : > { %v5705_v32 = vpop.f32.mrf.mxu1 }
 0x3a5   : > { %v5708_v4 = vpop.f32.mrf.mxu1 }
 0x3a6   : > { %6031 = vst [vmem:[#allocation9_spill] sm:$0xff] %v5708_v4  ;;  %v2405_v4 = vadd.f32 %v2404_v37, %v2337_v18  ;;  %v2756_v18 = vsel %vm1470_vm5, %v2714_v10, %v2715_v31  ;;  %v2719_v37 = vrot.slane %v3917_v53, 1  ;;  %v2754_v53 = vsel %vm1470_vm5, %v2716_v21, %v2717_v23 }
 0x3a7   : > { %v5715_v29 = vpop.f32.mrf.mxu1  ;;  %v2753_v31 = vsel %vm1470_vm5, %v2717_v23, %v2718_v16  ;;  %v2725_v23 = vrot.slane %v5702_v61, 1 }
 0x3a8   : > { %6033 = vst [vmem:[#allocation10_spill] sm:$0xff] %v5715_v29  ;;  %v2720_v29 = vrot.slane %v2633_v42, 1  ;;  %v2761_v42 = vadd.f32 %v2757_v20, %v2410_v62  ;;  %v2760_v51 = vadd.f32 %v2758_v33, %v2405_v4  ;;  %v5757_v62 = vpop.f32.mrf.mxu0  ;;  %v2752_v5 = vsel %vm1470_vm5, %v2718_v16, %v2719_v37 }
 0x3a9   : > { %v5726_v39 = vpop.f32.mrf.mxu1  ;;  %v2726_v4 = vrot.slane %v2663_v55, 1  ;;  %v2763_v33 = vadd.f32 %v2755_v47, %v2420_v34  ;;  %v2723_v16 = vrot.slane %v5692_v0, 1  ;;  %v2762_v34 = vadd.f32 %v2756_v18, %v2415_v22 }
 0x3aa   : > { %v2751_v2 = vsel %vm1470_vm5, %v2719_v37, %v2720_v29  ;;  %v5769_v21 = vsel %vm1470_vm5, %v2720_v29, %v2721_v63  ;;  %v2789_v54 = vadd.f32 %v5750_v50, %v2761_v42  ;;  %v2749_v29 = vsel %vm1470_vm5, %v2721_v63, %v2722_v13  ;;  %v2673_v47 = vpop.f32.mrf.mxu0 }
 0x3ab   : > { %v5740_v19 = vpop.f32.mrf.mxu1  ;;  %v2788_v20 = vadd.f32 %v5750_v50, %v2760_v51  ;;  %v2425_v37 = vadd.f32 %v5672_v24, %v5589_v17  ;;  %v5791_v0 = vsel %vm1470_vm5, %v2723_v16, %v2724_v38  ;;  %v5795_v61 = vsel %vm1470_vm5, %v2722_v13, %v2723_v16 }
 0x3ac   : > { %v5799_v42 = vsel %vm1470_vm5, %v2724_v38, %v2725_v23  ;;  %v2791_v18 = vadd.f32 %v5750_v50, %v2763_v33  ;;  %v2765_v17 = vadd.f32 %v2753_v31, %v2430_v28  ;;  %v5806_v24 = vsel %vm1470_vm5, %v2725_v23, %v2726_v4  ;;  %v5821_v23 = vpop.f32.mrf.mxu0 }
 0x3ad   : > { %v5755_v10 = vpop.f32.mrf.mxu1  ;;  %v5810_v63 = vsel %vm1470_vm5, %v2726_v4, %v2727_v46  ;;  %v2440_v51 = vadd.f32 %v5674_v9, %v5593_v26  ;;  %v2813_v22 = vmax.f32 %v2789_v54, 0.0  ;;  %v2790_v33 = vadd.f32 %v5750_v50, %v2762_v34 }
 0x3ae   : > { %v2764_v31 = vadd.f32 %v2754_v53, %v2425_v37  ;;  %v2812_v4 = vmax.f32 %v2788_v20, 0.0  ;;  %v2435_v26 = vadd.f32 %v5676_v58, %v5597_v48  ;;  %v2729_v34 = vrot.slane %v5757_v62, 1 }
 0x3af   : > { %v5771_v60 = vpop.f32.mrf.mxu1  ;;  %v2793_v53 = vadd.f32 %v5750_v50, %v2765_v17  ;;  %v2450_v37 = vadd.f32 %v5678_v6, %v5601_v57  ;;  %v2445_v62 = vadd.f32 %v5680_v36, %v5605_v1  ;;  %v2814_v57 = vmax.f32 %v2790_v33, 0.0 }
 0x3b0   : > { %6037 = vst [vmem:[#allocation11_spill] sm:$0xff] %v5771_v60  ;;  %v2792_v58 = vadd.f32 %v5750_v50, %v2764_v31  ;;  %v2460_v31 = vadd.f32 %v5682_v44, %v5609_v15  ;;  %v2455_v15 = vadd.f32 %v5686_v40, %v5613_v43  ;;  %v2470_v43 = vadd.f32 %v5688_v35, %v5617_v12 }
 0x3b1   : > { %v3946_v55 = vpop.f32.mrf.mxu1  ;;  %v2817_v36 = vmax.f32 %v2793_v53, 0.0  ;;  %v2731_v53 = vrot.slane %v5821_v23, 1 }
 0x3b2   : > { %v2964_v25 = vadd.f32 %v3946_v55, %v5778_v7  ;;  %v2728_v55 = vrot.slane %v2673_v47, 1  ;;  %v2816_v44 = vmax.f32 %v2792_v58, 0.0  ;;  %v2770_v23 = vadd.f32 %v5795_v61, %v2455_v15 }
 0x3b3   : > { %v2958_v13 = vpop.f32.mrf.mxu1  ;;  %v2773_v61 = vadd.f32 %v5806_v24, %v2470_v43 }
 0x3b4   : > { %v3078_v38 = vmax.f32 %v2964_v25, 0.0  ;;  %v2959_v16 = vadd.f32 %v5778_v7, %v2958_v13  ;;  %v2815_v25 = vmax.f32 %v2791_v18, 0.0  ;;  %v2767_v13 = vadd.f32 %v2751_v2, %v2440_v51  ;;  %v2683_v18 = vpop.f32.mrf.mxu0 }
 0x3b5   : > { %v3949_v28 = vpop.f32.mrf.mxu1  ;;  %v5838_v17 = vsel %vm1470_vm5, %v2727_v46, %v2728_v55  ;;  %v2766_v2 = vadd.f32 %v2752_v5, %v2435_v26  ;;  %v5847_v1 = vsel %vm1470_vm5, %v2728_v55, %v2729_v34  ;;  %v2801_v15 = vadd.f32 %v5750_v50, %v2773_v61 }
 0x3b6   : > { %v3102_v9 = vadd.f32 %v3078_v38, %v2813_v22  ;;  %v3077_v54 = vmax.f32 %v2959_v16, 0.0  ;;  %v2974_v47 = vadd.f32 %v3949_v28, %v5778_v7  ;;  %v2769_v16 = vadd.f32 %v2749_v29, %v2450_v37  ;;  %v5856_v28 = vpop.f32.mrf.mxu0 }
 0x3b7   : > { %v2968_v20 = vpop.f32.mrf.mxu1  ;;  %v2795_v33 = vadd.f32 %v5750_v50, %v2767_v13  ;;  %v2768_v29 = vadd.f32 %v5769_v21, %v2445_v62  ;;  %v2794_v26 = vadd.f32 %v5750_v50, %v2766_v2  ;;  %v2771_v37 = vadd.f32 %v5791_v0, %v2460_v31 }
 0x3b8   : > { %3126 = vst.msk [vmem:[%s5819_s13 + $0x8] sm:$0xff] %vm592_vm2, %v3102_v9  ;;  %v3101_v56 = vadd.f32 %v3077_v54, %v2812_v4  ;;  %v3080_v60 = vmax.f32 %v2974_v47, 0.0  ;;  %v2969_v48 = vadd.f32 %v5778_v7, %v2968_v20  ;;  %v2730_v4 = vrot.slane %v2683_v18, 1  ;;  %v2693_v35 = vpop.f32.mrf.mxu0 }
 0x3b9   : > { %v3952_v6 = vpop.f32.mrf.mxu1  ;;  %v2797_v21 = vadd.f32 %v5750_v50, %v2769_v16  ;;  %v2819_v20 = vmax.f32 %v2795_v33, 0.0  ;;  %v2796_v58 = vadd.f32 %v5750_v50, %v2768_v29  ;;  %v2465_v62 = vadd.f32 %v5690_v11, %v5621_v59 }
 0x3ba   : > { %3125 = vst.msk [vmem:[%s5819_s13] sm:$0xff] %vm592_vm2, %v3101_v56  ;;  %v3104_v51 = vadd.f32 %v3080_v60, %v2815_v25  ;;  %v3079_v22 = vmax.f32 %v2969_v48, 0.0  ;;  %v2984_v38 = vadd.f32 %v3952_v6, %v5778_v7  ;;  %v2741_v0 = vsel %vm1470_vm5, %v2729_v34, %v2730_v4 }
 0x3bb   : > { %v2978_v46 = vpop.f32.mrf.mxu1  ;;  %v2818_v6 = vmax.f32 %v2794_v26, 0.0  ;;  %v5883_v59 = vsel %vm1470_vm5, %v2730_v4, %v2731_v53  ;;  %v2821_v11 = vmax.f32 %v2797_v21, 0.0  ;;  %v2772_v24 = vadd.f32 %v5799_v42, %v2465_v62 }
 0x3bc   : > { %3128 = vst.msk [vmem:[%s5819_s13 + $0x18] sm:$0xff] %vm592_vm2, %v3104_v51  ;;  %v3103_v56 = vadd.f32 %v3079_v22, %v2814_v57  ;;  %v3082_v5 = vmax.f32 %v2984_v38, 0.0  ;;  %v2979_v60 = vadd.f32 %v5778_v7, %v2978_v46  ;;  %v2799_v51 = vadd.f32 %v5750_v50, %v2771_v37 }
 0x3bd   : > { %v3955_v55 = vpop.f32.mrf.mxu1  ;;  %v2480_v22 = vadd.f32 %v5694_v27, %v5625_v30  ;;  %v2798_v46 = vadd.f32 %v5750_v50, %v2770_v23  ;;  %v2820_v33 = vmax.f32 %v2796_v58, 0.0  ;;  %v2733_v29 = vrot.slane %v5856_v28, 1 }
 0x3be   : > { %3127 = vst.msk [vmem:[%s5819_s13 + $0x10] sm:$0xff] %vm592_vm2, %v3103_v56  ;;  %v3106_v9 = vadd.f32 %v3082_v5, %v2817_v36  ;;  %v3081_v54 = vmax.f32 %v2979_v60, 0.0  ;;  %v2994_v47 = vadd.f32 %v3955_v55, %v5778_v7  ;;  %v2732_v36 = vrot.slane %v2693_v35, 1  ;;  %v5892_v5 = vpop.f32.mrf.mxu0  ;;  %v6040_v35 = vld [vmem:[#allocation3_spill] sm:$0xff] }
 0x3bf   : > { %v2988_v40 = vpop.f32.mrf.mxu1  ;;  %v2475_v60 = vadd.f32 %v5696_v8, %v5629_v52  ;;  %v2490_v42 = vadd.f32 %v5700_v14, %v5633_v45  ;;  %v2775_v26 = vadd.f32 %v5838_v17, %v2480_v22  ;;  %v2485_v28 = vadd.f32 %v5705_v32, %v5637_v49 }
 0x3c0   : > { %3130 = vst.msk [vmem:[%s5819_s13 + $0x28] sm:$0xff] %vm592_vm2, %v3106_v9  ;;  %v3105_v25 = vadd.f32 %v3081_v54, %v2816_v44  ;;  %v3084_v13 = vmax.f32 %v2994_v47, 0.0  ;;  %v2989_v48 = vadd.f32 %v5778_v7, %v2988_v40  ;;  %v2823_v44 = vmax.f32 %v2799_v51, 0.0  ;;  %v5912_v21 = vpop.f32.mrf.mxu0 }
 0x3c1   : > { %v3958_v12 = vpop.f32.mrf.mxu1  ;;  %v2800_v54 = vadd.f32 %v5750_v50, %v2772_v24  ;;  %v2739_v47 = vsel %vm1470_vm5, %v2731_v53, %v2732_v36  ;;  %v2822_v45 = vmax.f32 %v2798_v46, 0.0  ;;  %v2774_v17 = vadd.f32 %v5810_v63, %v2475_v60 }
 0x3c2   : > { %3129 = vst.msk [vmem:[%s5819_s13 + $0x20] sm:$0xff] %vm592_vm2, %v3105_v25  ;;  %v3108_v57 = vadd.f32 %v3084_v13, %v2819_v20  ;;  %v3083_v18 = vmax.f32 %v2989_v48, 0.0  ;;  %v3004_v2 = vadd.f32 %v3958_v12, %v5778_v7  ;;  %v2777_v25 = vadd.f32 %v2741_v0, %v2490_v42  ;;  %v6038_v20 = vld [vmem:[#allocation2_spill] sm:$0xff]  ;;  %v6039_v13 = vld [vmem:[#allocation9_spill] sm:$0xff] }
 0x3c3   : > { %v2998_v34 = vpop.f32.mrf.mxu1  ;;  %v2500_v49 = vadd.f32 %v6039_v13, %v6038_v20  ;;  %v2738_v32 = vsel %vm1470_vm5, %v2732_v36, %v2733_v29  ;;  %v2825_v53 = vmax.f32 %v2801_v15, 0.0  ;;  %v2803_v58 = vadd.f32 %v5750_v50, %v2775_v26 }
 0x3c4   : > { %3132 = vst.msk [vmem:[%s5819_s13 + $0x38] sm:$0xff] %vm592_vm2, %v3108_v57  ;;  %v3107_v38 = vadd.f32 %v3083_v18, %v2818_v6  ;;  %v3086_v16 = vmax.f32 %v3004_v2, 0.0  ;;  %v2999_v31 = vadd.f32 %v5778_v7, %v2998_v34  ;;  %v2734_v0 = vrot.slane %v5912_v21, 1  ;;  %v6041_v57 = vld [vmem:[#allocation10_spill] sm:$0xff] }
 0x3c5   : > { %v3961_v56 = vpop.f32.mrf.mxu1  ;;  %v2776_v12 = vadd.f32 %v5847_v1, %v2485_v28  ;;  %v2495_v6 = vadd.f32 %v6041_v57, %v6040_v35  ;;  %v2824_v18 = vmax.f32 %v2800_v54, 0.0  ;;  %v2802_v51 = vadd.f32 %v5750_v50, %v2774_v17  ;;  %v6042_v1 = vld [vmem:[#allocation4_spill] sm:$0xff] }
 0x3c6   : > { %3131 = vst.msk [vmem:[%s5819_s13 + $0x30] sm:$0xff] %vm592_vm2, %v3107_v38  ;;  %v3110_v30 = vadd.f32 %v3086_v16, %v2821_v11  ;;  %v3085_v27 = vmax.f32 %v2999_v31, 0.0  ;;  %v3014_v4 = vadd.f32 %v3961_v56, %v5778_v7  ;;  %v2735_v22 = vrot.slane %v5892_v5, 1 }
 0x3c7   : > { %v3008_v55 = vpop.f32.mrf.mxu1  ;;  %v2805_v38 = vadd.f32 %v5750_v50, %v2777_v25  ;;  %v2779_v16 = vadd.f32 %v2739_v47, %v2500_v49  ;;  %v2510_v31 = vadd.f32 %v5726_v39, %v6042_v1  ;;  %v2827_v24 = vmax.f32 %v2803_v58, 0.0 }
 0x3c8   : > { %3134 = vst.msk [vmem:[%s5819_s13 + $0x48] sm:$0xff] %vm592_vm2, %v3110_v30  ;;  %v3109_v52 = vadd.f32 %v3085_v27, %v2820_v33  ;;  %v3088_v8 = vmax.f32 %v3014_v4, 0.0  ;;  %v3009_v9 = vadd.f32 %v5778_v7, %v3008_v55  ;;  %v2804_v60 = vadd.f32 %v5750_v50, %v2776_v12  ;;  %v6043_v27 = vld [vmem:[#allocation5_spill] sm:$0xff] }
 0x3c9   : > { %v3964_v14 = vpop.f32.mrf.mxu1  ;;  %v2778_v30 = vadd.f32 %v5883_v59, %v2495_v6  ;;  %v2737_v5 = vsel %vm1470_vm5, %v2733_v29, %v2734_v0  ;;  %v2505_v4 = vadd.f32 %v5740_v19, %v6043_v27  ;;  %v2826_v42 = vmax.f32 %v2802_v51, 0.0 }
 0x3ca   : > { %3133 = vst.msk [vmem:[%s5819_s13 + $0x40] sm:$0xff] %vm592_vm2, %v3109_v52  ;;  %v3112_v37 = vadd.f32 %v3088_v8, %v2823_v44  ;;  %v3087_v43 = vmax.f32 %v3009_v9, 0.0  ;;  %v3024_v40 = vadd.f32 %v3964_v14, %v5778_v7  ;;  %v2807_v26 = vadd.f32 %v5750_v50, %v2779_v16  ;;  %v6045_v8 = vld [vmem:[#allocation6_spill] sm:$0xff] }
 0x3cb   : > { %v3018_v48 = vpop.f32.mrf.mxu1  ;;  %v2781_v52 = vadd.f32 %v2737_v5, %v2510_v31  ;;  %v6044_v59 = vrot.slane %v5647_v3, 7  ;;  %v6046_v9 = vrot.slane %v6045_v8, 7  ;;  %v2829_v19 = vmax.f32 %v2805_v38, 0.0 }
 0x3cc   : > { %3136 = vst.msk [vmem:[%s5819_s13 + $0x58] sm:$0xff] %vm592_vm2, %v3112_v37  ;;  %v3111_v63 = vadd.f32 %v3087_v43, %v2822_v45  ;;  %v3090_v23 = vmax.f32 %v3024_v40, 0.0  ;;  %v3019_v62 = vadd.f32 %v5778_v7, %v3018_v48  ;;  %v2806_v21 = vadd.f32 %v5750_v50, %v2778_v30  ;;  %v6047_v43 = vld [vmem:[#allocation8_spill] sm:$0xff]  ;;  %v6048_v40 = vld [vmem:[#allocation11_spill] sm:$0xff] }
 0x3cd   : > { %v3967_v2 = vpop.f32.mrf.mxu1  ;;  %v2314_v29 = vsel %vm970_vm4, %v6046_v9, %v6044_v59  ;;  %v2780_v17 = vadd.f32 %v2738_v32, %v2505_v4  ;;  %v2828_v3 = vmax.f32 %v2804_v60, 0.0  ;;  %v2515_v25 = vadd.f32 %v6048_v40, %v6047_v43 }
 0x3ce   : > { %3135 = vst.msk [vmem:[%s5819_s13 + $0x50] sm:$0xff] %vm592_vm2, %v3111_v63  ;;  %v3114_v61 = vadd.f32 %v3090_v23, %v2825_v53  ;;  %v3089_v11 = vmax.f32 %v3019_v62, 0.0  ;;  %v3034_v34 = vadd.f32 %v3967_v2, %v5778_v7  ;;  %v2520_v28 = vadd.f32 %v5755_v10, %v2314_v29  ;;  %v6049_v53 = vld [vmem:[#allocation7_spill] sm:$0xff] }
 0x3cf   : > { %v3028_v36 = vpop.f32.mrf.mxu1  ;;  %v2809_v49 = vadd.f32 %v5750_v50, %v2781_v52  ;;  %v6050_v48 = vrot.slane %v6049_v53, 1  ;;  %v2831_v32 = vmax.f32 %v2807_v26, 0.0  ;;  %v2808_v57 = vadd.f32 %v5750_v50, %v2780_v17 }
 0x3d0   : > { %3138 = vst.msk [vmem:[%s5819_s13 + $0x68] sm:$0xff] %vm592_vm2, %v3114_v61  ;;  %v3113_v46 = vadd.f32 %v3089_v11, %v2824_v18  ;;  %v3092_v33 = vmax.f32 %v3034_v34, 0.0  ;;  %v3029_v56 = vadd.f32 %v5778_v7, %v3028_v36  ;;  %v2736_v6 = vsel %vm1470_vm5, %v2734_v0, %v2735_v22 }
 0x3d1   : > { %v3970_v39 = vpop.f32.mrf.mxu1  ;;  %v2759_v58 = vsel %vm1470_vm5, %v2735_v22, %v6050_v48  ;;  %v2830_v18 = vmax.f32 %v2806_v21, 0.0  ;;  %v2782_v51 = vadd.f32 %v2736_v6, %v2515_v25  ;;  %v2833_v38 = vmax.f32 %v2809_v49, 0.0 }
 0x3d2   : > { %3137 = vst.msk [vmem:[%s5819_s13 + $0x60] sm:$0xff] %vm592_vm2, %v3113_v46  ;;  %v3116_v15 = vadd.f32 %v3092_v33, %v2827_v24  ;;  %v3091_v44 = vmax.f32 %v3029_v56, 0.0  ;;  %v3044_v55 = vadd.f32 %v3970_v39, %v5778_v7  ;;  %v2783_v23 = vadd.f32 %v2759_v58, %v2520_v28 }
 0x3d3   : > { %v3038_v54 = vpop.f32.mrf.mxu1  ;;  %v2832_v22 = vmax.f32 %v2808_v57, 0.0  ;;  %v2810_v46 = vadd.f32 %v5750_v50, %v2782_v51 }
 0x3d4   : > { %3140 = vst.msk [vmem:[%s5819_s13 + $0x78] sm:$0xff] %vm592_vm2, %v3116_v15  ;;  %v3115_v47 = vadd.f32 %v3091_v44, %v2826_v42  ;;  %v3094_v45 = vmax.f32 %v3044_v55, 0.0  ;;  %v3039_v14 = vadd.f32 %v5778_v7, %v3038_v54  ;;  %v2811_v1 = vadd.f32 %v5750_v50, %v2783_v23 }
 0x3d5   : > { %v3973_v37 = vpop.f32.mrf.mxu1  ;;  %v2834_v15 = vmax.f32 %v2810_v46, 0.0 }
 0x3d6   : > { %3139 = vst.msk [vmem:[%s5819_s13 + $0x70] sm:$0xff] %vm592_vm2, %v3115_v47  ;;  %v3118_v20 = vadd.f32 %v3094_v45, %v2829_v19  ;;  %v3093_v13 = vmax.f32 %v3039_v14, 0.0  ;;  %v3054_v10 = vadd.f32 %v3973_v37, %v5778_v7  ;;  %v2835_v5 = vmax.f32 %v2811_v1, 0.0 }
 0x3d7   : > { %v3048_v63 = vpop.f32.mrf.mxu1 }
 0x3d8   : > { %3142 = vst.msk [vmem:[%s5819_s13 + $0x88] sm:$0xff] %vm592_vm2, %v3118_v20  ;;  %v3117_v62 = vadd.f32 %v3093_v13, %v2828_v3  ;;  %v3096_v12 = vmax.f32 %v3054_v10, 0.0  ;;  %v3049_v35 = vadd.f32 %v5778_v7, %v3048_v63 }
 0x3d9   : > { %v3976_v2 = vpop.f32.mrf.mxu1 }
 0x3da   : > { %3141 = vst.msk [vmem:[%s5819_s13 + $0x80] sm:$0xff] %vm592_vm2, %v3117_v62  ;;  %v3120_v61 = vadd.f32 %v3096_v12, %v2831_v32  ;;  %v3095_v11 = vmax.f32 %v3049_v35, 0.0  ;;  %v3064_v34 = vadd.f32 %v3976_v2, %v5778_v7 }
 0x3db   : > { %v3058_v16 = vpop.f32.mrf.mxu1 }
 0x3dc   : > { %3144 = vst.msk [vmem:[%s5819_s13 + $0x98] sm:$0xff] %vm592_vm2, %v3120_v61  ;;  %v3119_v31 = vadd.f32 %v3095_v11, %v2830_v18  ;;  %v3098_v41 = vmax.f32 %v3064_v34, 0.0  ;;  %v3059_v0 = vadd.f32 %v5778_v7, %v3058_v16 }
 0x3dd   : > { %v3979_v36 = vpop.f32.mrf.mxu1 }
 0x3de   : > { %3143 = vst.msk [vmem:[%s5819_s13 + $0x90] sm:$0xff] %vm592_vm2, %v3119_v31  ;;  %v3122_v24 = vadd.f32 %v3098_v41, %v2833_v38  ;;  %v3097_v33 = vmax.f32 %v3059_v0, 0.0  ;;  %v3074_v56 = vadd.f32 %v3979_v36, %v5778_v7 }
 0x3df   : > { %v3068_v60 = vpop.f32.mrf.mxu1 }
 0x3e0   : > { %3146 = vst.msk [vmem:[%s5819_s13 + $0xa8] sm:$0xff] %vm592_vm2, %v3122_v24  ;;  %v3121_v30 = vadd.f32 %v3097_v33, %v2832_v22  ;;  %v3100_v27 = vmax.f32 %v3074_v56, 0.0  ;;  %v3069_v4 = vadd.f32 %v5778_v7, %v3068_v60 }
 0x3e2   : > { %3145 = vst.msk [vmem:[%s5819_s13 + $0xa0] sm:$0xff] %vm592_vm2, %v3121_v30  ;;  %v3124_v39 = vadd.f32 %v3100_v27, %v2835_v5  ;;  %v3099_v50 = vmax.f32 %v3069_v4, 0.0 }
 0x3e4   : > { %3148 = vst.msk [vmem:[%s5819_s13 + $0xb8] sm:$0xff] %vm592_vm2, %v3124_v39  ;;  %v3123_v42 = vadd.f32 %v3099_v50, %v2834_v15 }
 0x3e6   : > { %3147 = vst.msk [vmem:[%s5819_s13 + $0xb0] sm:$0xff] %vm592_vm2, %v3123_v42 }
 0x3e7 PF: > { %s16_s25 = sadd.s32 1, %s4096_s25   ;;  %s6051_s21 = smov %s4088_s23 }
 0x3e8   : > { %p13_p8 = scmp.ge.s32.totalorder %s16_s25, 6   ;;  %s6052_s22 = smov %s4092_s24 }
 0x3e9   : > { %s6053_s23 = smov %s6056_s26  ;;  %s6054_s24 = smov %s6060_s27 }
 0x3ea   :  { %15 = sbr.rel (!%p13_p8) target bundleno = 3 (0x3), region = 81 }

</bundles_post_ra>
